<compile_context>
chip_gen: v5e
topology: v5e:2x2
jax: 0.10.0
libtpu: 0.0.40
codegen_flags: <defaults>
</compile_context>

<pallas_src>
import functools

import jax
import jax.numpy as jnp
from jax import lax
from jax.experimental import pallas as pl
from jax.experimental.pallas import tpu as pltpu


def _round_up(x, m):
    return ((x + m - 1) // m) * m


def _pick_row_tile(M, tile_m=256):
    """Row tile for the projection / final kernels.

    Aims for >= 4 grid steps (pipelining + sharding across both v7x TensorCores)
    while keeping the sublane dim a multiple of 8.
    """
    if M < 16:
        return M
    return min(tile_m, max(8, _round_up(pl.cdiv(M, 4), 8)))


# ----------------------------------------------------------------------------
# Kernel 1: fused K/V/Q projection   (one launch instead of three)
# ----------------------------------------------------------------------------
def _qkv_proj_kernel(xk_ref, xv_ref, xq_ref, w_ref, b_ref,
                     k_ref, v_ref, q_ref, *, compute_dtype):
    # General (cross-attention) path: three matmuls, stacked (3, D, D) weight.
    # The softmax scale is already folded into w[2]/b[2] (the Q projection).
    k_ref[...] = (jnp.dot(xk_ref[...].astype(compute_dtype), w_ref[0],
                          preferred_element_type=jnp.float32)
                  + b_ref[0]).astype(k_ref.dtype)
    v_ref[...] = (jnp.dot(xv_ref[...].astype(compute_dtype), w_ref[1],
                          preferred_element_type=jnp.float32)
                  + b_ref[1]).astype(v_ref.dtype)
    q_ref[...] = (jnp.dot(xq_ref[...].astype(compute_dtype), w_ref[2],
                          preferred_element_type=jnp.float32)
                  + b_ref[2]).astype(q_ref.dtype)


def _qkv_proj_self_kernel(x_ref, w_ref, b_ref, k_ref, v_ref, q_ref,
                          *, model_dim, compute_dtype):
    # Self-attention fast path: the activation is read once and one wide
    # (tm, D) x (D, 3D) matmul feeds all three projections.
    x = x_ref[...].astype(compute_dtype)
    y = jnp.dot(x, w_ref[...], preferred_element_type=jnp.float32) + b_ref[...]
    D = model_dim
    k_ref[...] = y[:, :D].astype(k_ref.dtype)
    v_ref[...] = y[:, D:2 * D].astype(v_ref.dtype)
    q_ref[...] = y[:, 2 * D:].astype(q_ref.dtype)


def pallas_qkv_proj(xk, xv, xq, wk, wv, wq, bk, bv, bq, *, self_attention,
                    out_dtype=jnp.bfloat16, compute_dtype=jnp.bfloat16, tile_m=256):
    M, D = xq.shape
    tm = _pick_row_tile(M, tile_m)
    grid = (pl.cdiv(M, tm),)
    out_shape = tuple(jax.ShapeDtypeStruct((M, D), out_dtype) for _ in range(3))
    out_specs = tuple(pl.BlockSpec((tm, D), lambda i: (i, 0)) for _ in range(3))
    cparams = pltpu.CompilerParams(dimension_semantics=("parallel",))
    n_act_reads = 1 if self_attention else 3
    cost = pl.CostEstimate(
        flops=int(6 * M * D * D),
        transcendentals=0,
        bytes_accessed=int(n_act_reads * M * D * 4 + 3 * D * D * 2 + 3 * M * D * 2),
    )

    if self_attention:
        w = jnp.concatenate([wk, wv, wq], axis=1).astype(compute_dtype)   # (D, 3D)
        b = jnp.concatenate([bk, bv, bq], axis=1)                          # (1, 3D)
        kernel = functools.partial(_qkv_proj_self_kernel, model_dim=D,
                                   compute_dtype=compute_dtype)
        return pl.pallas_call(
            kernel, out_shape=out_shape, grid=grid,
            in_specs=[pl.BlockSpec((tm, D), lambda i: (i, 0)),
                      pl.BlockSpec((D, 3 * D), lambda i: (0, 0)),
                      pl.BlockSpec((1, 3 * D), lambda i: (0, 0))],
            out_specs=out_specs,
            compiler_params=cparams, cost_estimate=cost,
        )(xq, w, b)

    w = jnp.stack([wk, wv, wq], axis=0).astype(compute_dtype)   # (3, D, D)
    b = jnp.stack([bk, bv, bq], axis=0)                          # (3, 1, D)
    kernel = functools.partial(_qkv_proj_kernel, compute_dtype=compute_dtype)
    return pl.pallas_call(
        kernel, out_shape=out_shape, grid=grid,
        in_specs=[pl.BlockSpec((tm, D), lambda i: (i, 0)),
                  pl.BlockSpec((tm, D), lambda i: (i, 0)),
                  pl.BlockSpec((tm, D), lambda i: (i, 0)),
                  pl.BlockSpec((3, D, D), lambda i: (0, 0, 0)),
                  pl.BlockSpec((3, 1, D), lambda i: (0, 0, 0))],
        out_specs=out_specs,
        compiler_params=cparams, cost_estimate=cost,
    )(xk, xv, xq, w, b)


# ----------------------------------------------------------------------------
# Kernel 2: scaled-dot-product attention over (batch*head) slices
#   attention = softmax(q @ k^T)   (scale already folded into the Q projection)
#   context   = attention @ v
# ----------------------------------------------------------------------------
def _sdpa_kernel(q_ref, k_ref, v_ref, ctx_ref, attn_ref, *, compute_dtype):
    q = q_ref[...]            # (tbh, Sq, dh) bf16, pre-scaled
    k = k_ref[...]            # (tbh, Sk, dh) bf16
    v = v_ref[...]            # (tbh, Sk, dh) bf16

    # Batched q @ k^T without materializing a transpose: contract last dims on MXU.
    s = lax.dot_general(q, k,
                        dimension_numbers=(((2,), (2,)), ((0,), (0,))),
                        preferred_element_type=jnp.float32)          # (tbh, Sq, Sk)

    m = jnp.max(s, axis=-1, keepdims=True)
    e = jnp.exp(s - m)
    denom = jnp.sum(e, axis=-1, keepdims=True)
    # Exact reciprocal of the tiny (tbh, Sq, 1) denominator: attention is a
    # user-visible output, so rows sum to 1 up to f32 rounding.
    p = e * pl.reciprocal(denom)
    attn_ref[...] = p.astype(attn_ref.dtype)

    ctx = lax.dot_general(p.astype(compute_dtype), v,
                          dimension_numbers=(((2,), (1,)), ((0,), (0,))),
                          preferred_element_type=jnp.float32)        # (tbh, Sq, dh)
    ctx_ref[...] = ctx.astype(ctx_ref.dtype)
    # TODO(synk): attn_mask (masked_fill_) and dropout>0 paths are unused by the
    # module defaults and are omitted.


def _choose_head_tile(BH, Sq, Sk, dh, *, vmem_budget=12 << 20):
    """Head-batch per grid step.

    Caps at BH//2 so the grid always has >= 2 (even) steps - double buffering and
    v7x megacore sharding both need it - and budgets double-buffered inputs AND
    outputs plus the f32 score temporaries against a conservative ~12 MiB
    (safe under v7x's 32 MiB scoped / 64 MiB physical VMEM).
    """
    tbh = max(1, min(BH // 2, 256 // max(dh, 1)))

    def vmem_bytes(t):
        qkv = 2 * t * (Sq + 2 * Sk) * dh * 2            # double-buffered bf16 inputs
        outs = 2 * t * Sq * (Sk * 4 + dh * 2)            # double-buffered f32 attn + bf16 ctx
        tmps = 3 * t * Sq * Sk * 4                       # s, e, p f32 temporaries
        return qkv + outs + tmps

    while tbh > 1 and vmem_bytes(tbh) > vmem_budget:
        tbh -= 1
    while tbh > 1 and BH % tbh != 0:                     # keep the grid evenly divided
        tbh -= 1
    return tbh


def pallas_sdpa(q, k, v, *, attn_dtype=jnp.float32, ctx_dtype=jnp.bfloat16,
                compute_dtype=jnp.bfloat16):
    BH, Sq, dh = q.shape
    Sk = k.shape[1]
    tbh = _choose_head_tile(BH, Sq, Sk, dh)
    kernel = functools.partial(_sdpa_kernel, compute_dtype=compute_dtype)
    # NOTE: the f32 attention writeback is the dominant HBM stream here; emitting it
    # bf16 (and upcasting in the wrapper) is a near-2x SDPA win on v5e/v6e, but the
    # module contract is an f32 attention matrix so f32 is kept by default.
    cost = pl.CostEstimate(
        flops=int(4 * BH * Sq * Sk * dh),
        transcendentals=int(BH * Sq * Sk),
        bytes_accessed=int(BH * ((Sq + 2 * Sk) * dh * 2 + Sq * Sk * 4 + Sq * dh * 2)),
    )
    return pl.pallas_call(
        kernel,
        out_shape=(
            jax.ShapeDtypeStruct((BH, Sq, dh), ctx_dtype),
            jax.ShapeDtypeStruct((BH, Sq, Sk), attn_dtype),
        ),
        grid=(pl.cdiv(BH, tbh),),
        in_specs=[
            pl.BlockSpec((tbh, Sq, dh), lambda i: (i, 0, 0)),
            pl.BlockSpec((tbh, Sk, dh), lambda i: (i, 0, 0)),
            pl.BlockSpec((tbh, Sk, dh), lambda i: (i, 0, 0)),
        ],
        out_specs=(
            pl.BlockSpec((tbh, Sq, dh), lambda i: (i, 0, 0)),
            pl.BlockSpec((tbh, Sq, Sk), lambda i: (i, 0, 0)),
        ),
        compiler_params=pltpu.CompilerParams(dimension_semantics=("parallel",)),
        cost_estimate=cost,
    )(q, k, v)


# ----------------------------------------------------------------------------
# Kernel 3: final linear + residual add + LayerNorm (eps=1e-5, over last dim)
# ----------------------------------------------------------------------------
def _final_kernel(ctx_ref, w_ref, b_ref, res_ref, g_ref, beta_ref, o_ref, *, eps):
    y = jnp.dot(ctx_ref[...], w_ref[...],
                preferred_element_type=jnp.float32) + b_ref[...]
    y = y + res_ref[...].astype(jnp.float32)
    mean = jnp.mean(y, axis=-1, keepdims=True)
    var = jnp.mean(jnp.square(y - mean), axis=-1, keepdims=True)
    o_ref[...] = (y - mean) * lax.rsqrt(var + eps) * g_ref[...] + beta_ref[...]


def pallas_final(ctx2d, w, b2d, res2d, gamma2d, beta2d, *, eps=1e-5,
                 compute_dtype=jnp.bfloat16, tile_m=256):
    M, D = res2d.shape
    tm = _pick_row_tile(M, tile_m)
    w = w.astype(compute_dtype)
    kernel = functools.partial(_final_kernel, eps=eps)
    cost = pl.CostEstimate(
        flops=int(2 * M * D * D + 10 * M * D),
        transcendentals=int(M),
        bytes_accessed=int(M * D * 2 + D * D * 2 + M * D * 4 + M * D * 4),
    )
    return pl.pallas_call(
        kernel,
        out_shape=jax.ShapeDtypeStruct((M, D), jnp.float32),
        grid=(pl.cdiv(M, tm),),
        in_specs=[
            pl.BlockSpec((tm, D), lambda i: (i, 0)),
            pl.BlockSpec((D, D), lambda i: (0, 0)),     # weight stays VMEM-resident
            pl.BlockSpec((1, D), lambda i: (0, 0)),
            pl.BlockSpec((tm, D), lambda i: (i, 0)),
            pl.BlockSpec((1, D), lambda i: (0, 0)),
            pl.BlockSpec((1, D), lambda i: (0, 0)),
        ],
        out_specs=pl.BlockSpec((tm, D), lambda i: (i, 0)),
        compiler_params=pltpu.CompilerParams(dimension_semantics=("parallel",)),
        cost_estimate=cost,
    )(ctx2d, w, b2d, res2d, gamma2d, beta2d)


# ----------------------------------------------------------------------------
# Full module forward (glue in plain JAX, hot paths in Pallas)
# ----------------------------------------------------------------------------
def multi_head_attention(params, key, value, query, num_heads, self_attention=False,
                         compute_dtype=jnp.bfloat16):
    B, Sq, D = query.shape
    Sk = key.shape[1]
    dh = D // num_heads
    assert D % num_heads == 0, "model_dim must be divisible by num_heads"
    # Matches (key.size(-1) // num_heads) ** -0.5 exactly (integer division quirk);
    # fail loudly instead of dividing by zero when dim_per_head < num_heads.
    assert dh // num_heads > 0, (
        f"dim_per_head // num_heads == 0 (dh={dh}, H={num_heads}); the original "
        "module would raise ZeroDivisionError here.")
    scale = float((dh // num_heads) ** (-0.5))

    residual = query

    # Fold the softmax scale into the Q projection weights (one tiny (D,D) scale
    # per call) so the SDPA kernel does no per-tile rescaling.
    wq = params["wQ"] * scale
    bq = params["bQ"] * scale

    k2d, v2d, q2d = pallas_qkv_proj(
        key.reshape(B * Sk, D), value.reshape(B * Sk, D), query.reshape(B * Sq, D),
        params["wK"], params["wV"], wq, params["bK"], params["bV"], bq,
        self_attention=self_attention,
        out_dtype=compute_dtype, compute_dtype=compute_dtype)

    # exact PyTorch .view(batch*heads, -1, dim_per_head) semantics (contiguous reshape)
    k3 = k2d.reshape(B * num_heads, Sk, dh)
    v3 = v2d.reshape(B * num_heads, Sk, dh)
    q3 = q2d.reshape(B * num_heads, Sq, dh)

    context, attention = pallas_sdpa(q3, k3, v3, compute_dtype=compute_dtype)

    context = context.reshape(B * Sq, D)   # contiguous reshape, matches .view
    out = pallas_final(
        context, params["wF"], params["bF"],
        residual.reshape(B * Sq, D), params["ln_g"], params["ln_b"],
        compute_dtype=compute_dtype,
    )
    return out.reshape(B, Sq, D), attention


# pure-JAX f32 reference for sanity checking
def reference(params, key, value, query, num_heads):
    B, S, D = query.shape
    dh = D // num_heads
    residual = query
    k = key.reshape(B * S, D) @ params["wK"] + params["bK"]
    v = value.reshape(B * S, D) @ params["wV"] + params["bV"]
    q = query.reshape(B * S, D) @ params["wQ"] + params["bQ"]
    k = k.reshape(B * num_heads, S, dh)
    v = v.reshape(B * num_heads, S, dh)
    q = q.reshape(B * num_heads, S, dh)
    scale = float((dh // num_heads) ** (-0.5))
    s = jnp.einsum("bqd,bkd->bqk", q, k) * scale
    p = jax.nn.softmax(s, axis=-1)
    ctx = jnp.einsum("bqk,bkd->bqd", p, v).reshape(B * S, D)
    out = ctx @ params["wF"] + params["bF"] + residual.reshape(B * S, D)
    mean = jnp.mean(out, axis=-1, keepdims=True)
    var = jnp.mean((out - mean) ** 2, axis=-1, keepdims=True)
    out = (out - mean) * lax.rsqrt(var + 1e-5) * params["ln_g"] + params["ln_b"]
    return out.reshape(B, S, D), p


if __name__ == "__main__":
    # batch=2, seq=32, model_dim=64, heads=4  -> dh=16, BH=8, M=64
    # (grid steps: QKV/final = 4 row tiles, SDPA = 2 head-batches)
    B, S, D, H = 2, 32, 64, 4

    root = jax.random.PRNGKey(0)
    keys = jax.random.split(root, 11)
    init = lambda kk, shape: (0.1 * jax.random.normal(kk, shape)).astype(jnp.float32)

    params = {
        "wK": init(keys[0], (D, D)), "bK": init(keys[1], (1, D)),
        "wV": init(keys[2], (D, D)), "bV": init(keys[3], (1, D)),
        "wQ": init(keys[4], (D, D)), "bQ": init(keys[5], (1, D)),
        "wF": init(keys[6], (D, D)), "bF": init(keys[7], (1, D)),
        "ln_g": jnp.ones((1, D), jnp.float32),
        "ln_b": jnp.zeros((1, D), jnp.float32),
    }

    key_in = init(keys[8], (B, S, D))
    value_in = init(keys[9], (B, S, D))
    query_in = init(keys[10], (B, S, D))

    mha = jax.jit(multi_head_attention, static_argnums=(4, 5))

    # --- cross-attention path (general fused QKV kernel) ---
    out, attn = mha(params, key_in, value_in, query_in, H, False)
    jax.block_until_ready((out, attn))
    out_ref, attn_ref = reference(params, key_in, value_in, query_in, H)
    err_out = float(jnp.max(jnp.abs(out - out_ref)))
    err_attn = float(jnp.max(jnp.abs(attn - attn_ref)))
    assert jnp.allclose(out, out_ref, atol=3e-2, rtol=3e-2), f"out err={err_out}"
    assert jnp.allclose(attn, attn_ref, atol=2e-3, rtol=5e-2), f"attn err={err_attn}"

    # --- self-attention path (single stacked (D, 3D) matmul) ---
    out_s, attn_s = mha(params, query_in, query_in, query_in, H, True)
    jax.block_until_ready((out_s, attn_s))
    out_sref, attn_sref = reference(params, query_in, query_in, query_in, H)
    err_out_s = float(jnp.max(jnp.abs(out_s - out_sref)))
    err_attn_s = float(jnp.max(jnp.abs(attn_s - attn_sref)))
    assert jnp.allclose(out_s, out_sref, atol=3e-2, rtol=3e-2), f"out err={err_out_s}"
    assert jnp.allclose(attn_s, attn_sref, atol=2e-3, rtol=5e-2), f"attn err={err_attn_s}"

    print("KERNEL_OK")
</pallas_src>

<mosaic_0001>
module attributes {stable_mosaic.version = 11 : i64} {
  func.func @_qkv_proj_kernel(%arg0: i32, %arg1: memref<16x64xf32, #tpu.memory_space<vmem>>, %arg2: memref<16x64xf32, #tpu.memory_space<vmem>>, %arg3: memref<16x64xf32, #tpu.memory_space<vmem>>, %arg4: memref<3x64x64xbf16, #tpu.memory_space<vmem>>, %arg5: memref<3x1x64xf32, #tpu.memory_space<vmem>>, %arg6: memref<16x64xbf16, #tpu.memory_space<vmem>>, %arg7: memref<16x64xbf16, #tpu.memory_space<vmem>>, %arg8: memref<16x64xbf16, #tpu.memory_space<vmem>>) attributes {dimension_semantics = [#tpu.dimension_semantics<parallel>], iteration_bounds = array<i64: 4>, scalar_prefetch = 0 : i64, scratch_operands = 0 : i64, tpu.core_type = #tpu.core_type<tc>, window_params = [{transform_indices = @transform_0, window_bounds = array<i64: 16, 64>}, {transform_indices = @transform_1, window_bounds = array<i64: 16, 64>}, {transform_indices = @transform_2, window_bounds = array<i64: 16, 64>}, {pipeline_mode = #tpu.pipeline_mode<synchronous>, transform_indices = @transform_3, window_bounds = array<i64: 3, 64, 64>}, {pipeline_mode = #tpu.pipeline_mode<synchronous>, transform_indices = @transform_4, window_bounds = array<i64: 3, 1, 64>}, {transform_indices = @transform_5, window_bounds = array<i64: 16, 64>}, {transform_indices = @transform_6, window_bounds = array<i64: 16, 64>}, {transform_indices = @transform_7, window_bounds = array<i64: 16, 64>}]} {
    %c0 = arith.constant 0 : index
    %c0_0 = arith.constant 0 : index
    %0 = vector.load %arg1[%c0, %c0_0] : memref<16x64xf32, #tpu.memory_space<vmem>>, vector<16x64xf32>
    %1 = arith.truncf %0 : vector<16x64xf32> to vector<16x64xbf16>
    %c0_1 = arith.constant 0 : index
    %c0_2 = arith.constant 0 : index
    %c0_3 = arith.constant 0 : index
    %2 = vector.load %arg4[%c0_1, %c0_2, %c0_3] : memref<3x64x64xbf16, #tpu.memory_space<vmem>>, vector<1x64x64xbf16>
    %3 = vector.shape_cast %2 : vector<1x64x64xbf16> to vector<64x64xbf16>
    %cst = arith.constant dense<0.000000e+00> : vector<16x64xf32>
    %4 = tpu.matmul %1, %3, %cst {dimension_numbers = #tpu.dot_dimension_numbers<[1], [0], [0], [1], [0, 0, 1, 1], [], []>} : vector<16x64xbf16>, vector<64x64xbf16>, vector<16x64xf32> -> vector<16x64xf32>
    %c0_4 = arith.constant 0 : index
    %c0_5 = arith.constant 0 : index
    %c0_6 = arith.constant 0 : index
    %5 = vector.load %arg5[%c0_4, %c0_5, %c0_6] : memref<3x1x64xf32, #tpu.memory_space<vmem>>, vector<1x1x64xf32>
    %6 = vector.shape_cast %5 : vector<1x1x64xf32> to vector<1x64xf32>
    %7 = vector.broadcast %6 : vector<1x64xf32> to vector<16x64xf32>
    %8 = arith.addf %4, %7 : vector<16x64xf32>
    %9 = arith.truncf %8 : vector<16x64xf32> to vector<16x64xbf16>
    %c0_7 = arith.constant 0 : index
    %c0_8 = arith.constant 0 : index
    %10 = vector.load %arg6[%c0_7, %c0_8] : memref<16x64xbf16, #tpu.memory_space<vmem>>, vector<16x64xbf16>
    tpu.vector_store %arg6[%c0_7, %c0_8], %9 {strides = array<i32>} : memref<16x64xbf16, #tpu.memory_space<vmem>>, vector<16x64xbf16>,
    %c0_9 = arith.constant 0 : index
    %c0_10 = arith.constant 0 : index
    %11 = vector.load %arg2[%c0_9, %c0_10] : memref<16x64xf32, #tpu.memory_space<vmem>>, vector<16x64xf32>
    %12 = arith.truncf %11 : vector<16x64xf32> to vector<16x64xbf16>
    %c1 = arith.constant 1 : index
    %c0_11 = arith.constant 0 : index
    %c0_12 = arith.constant 0 : index
    %13 = vector.load %arg4[%c1, %c0_11, %c0_12] : memref<3x64x64xbf16, #tpu.memory_space<vmem>>, vector<1x64x64xbf16>
    %14 = vector.shape_cast %13 : vector<1x64x64xbf16> to vector<64x64xbf16>
    %cst_13 = arith.constant dense<0.000000e+00> : vector<16x64xf32>
    %15 = tpu.matmul %12, %14, %cst_13 {dimension_numbers = #tpu.dot_dimension_numbers<[1], [0], [0], [1], [0, 0, 1, 1], [], []>} : vector<16x64xbf16>, vector<64x64xbf16>, vector<16x64xf32> -> vector<16x64xf32>
    %c1_14 = arith.constant 1 : index
    %c0_15 = arith.constant 0 : index
    %c0_16 = arith.constant 0 : index
    %16 = vector.load %arg5[%c1_14, %c0_15, %c0_16] : memref<3x1x64xf32, #tpu.memory_space<vmem>>, vector<1x1x64xf32>
    %17 = vector.shape_cast %16 : vector<1x1x64xf32> to vector<1x64xf32>
    %18 = vector.broadcast %17 : vector<1x64xf32> to vector<16x64xf32>
    %19 = arith.addf %15, %18 : vector<16x64xf32>
    %20 = arith.truncf %19 : vector<16x64xf32> to vector<16x64xbf16>
    %c0_17 = arith.constant 0 : index
    %c0_18 = arith.constant 0 : index
    %21 = vector.load %arg7[%c0_17, %c0_18] : memref<16x64xbf16, #tpu.memory_space<vmem>>, vector<16x64xbf16>
    tpu.vector_store %arg7[%c0_17, %c0_18], %20 {strides = array<i32>} : memref<16x64xbf16, #tpu.memory_space<vmem>>, vector<16x64xbf16>,
    %c0_19 = arith.constant 0 : index
    %c0_20 = arith.constant 0 : index
    %22 = vector.load %arg3[%c0_19, %c0_20] : memref<16x64xf32, #tpu.memory_space<vmem>>, vector<16x64xf32>
    %23 = arith.truncf %22 : vector<16x64xf32> to vector<16x64xbf16>
    %c2 = arith.constant 2 : index
    %c0_21 = arith.constant 0 : index
    %c0_22 = arith.constant 0 : index
    %24 = vector.load %arg4[%c2, %c0_21, %c0_22] : memref<3x64x64xbf16, #tpu.memory_space<vmem>>, vector<1x64x64xbf16>
    %25 = vector.shape_cast %24 : vector<1x64x64xbf16> to vector<64x64xbf16>
    %cst_23 = arith.constant dense<0.000000e+00> : vector<16x64xf32>
    %26 = tpu.matmul %23, %25, %cst_23 {dimension_numbers = #tpu.dot_dimension_numbers<[1], [0], [0], [1], [0, 0, 1, 1], [], []>} : vector<16x64xbf16>, vector<64x64xbf16>, vector<16x64xf32> -> vector<16x64xf32>
    %c2_24 = arith.constant 2 : index
    %c0_25 = arith.constant 0 : index
    %c0_26 = arith.constant 0 : index
    %27 = vector.load %arg5[%c2_24, %c0_25, %c0_26] : memref<3x1x64xf32, #tpu.memory_space<vmem>>, vector<1x1x64xf32>
    %28 = vector.shape_cast %27 : vector<1x1x64xf32> to vector<1x64xf32>
    %29 = vector.broadcast %28 : vector<1x64xf32> to vector<16x64xf32>
    %30 = arith.addf %26, %29 : vector<16x64xf32>
    %31 = arith.truncf %30 : vector<16x64xf32> to vector<16x64xbf16>
    %c0_27 = arith.constant 0 : index
    %c0_28 = arith.constant 0 : index
    %32 = vector.load %arg8[%c0_27, %c0_28] : memref<16x64xbf16, #tpu.memory_space<vmem>>, vector<16x64xbf16>
    tpu.vector_store %arg8[%c0_27, %c0_28], %31 {strides = array<i32>} : memref<16x64xbf16, #tpu.memory_space<vmem>>, vector<16x64xbf16>,
    return
  }
  func.func @transform_0(%arg0: i32) -> (i32, i32) {
    %c0_i32 = arith.constant 0 : i32
    %c0_i32_0 = arith.constant 0 : i32
    return %arg0, %c0_i32 : i32, i32
  }
  func.func @transform_1(%arg0: i32) -> (i32, i32) {
    %c0_i32 = arith.constant 0 : i32
    %c0_i32_0 = arith.constant 0 : i32
    return %arg0, %c0_i32 : i32, i32
  }
  func.func @transform_2(%arg0: i32) -> (i32, i32) {
    %c0_i32 = arith.constant 0 : i32
    %c0_i32_0 = arith.constant 0 : i32
    return %arg0, %c0_i32 : i32, i32
  }
  func.func @transform_3(%arg0: i32) -> (i32, i32, i32) {
    %c0_i32 = arith.constant 0 : i32
    %c0_i32_0 = arith.constant 0 : i32
    %c0_i32_1 = arith.constant 0 : i32
    %c0_i32_2 = arith.constant 0 : i32
    return %c0_i32, %c0_i32_0, %c0_i32_1 : i32, i32, i32
  }
  func.func @transform_4(%arg0: i32) -> (i32, i32, i32) {
    %c0_i32 = arith.constant 0 : i32
    %c0_i32_0 = arith.constant 0 : i32
    %c0_i32_1 = arith.constant 0 : i32
    %c0_i32_2 = arith.constant 0 : i32
    return %c0_i32, %c0_i32_0, %c0_i32_1 : i32, i32, i32
  }
  func.func @transform_5(%arg0: i32) -> (i32, i32) {
    %c0_i32 = arith.constant 0 : i32
    %c0_i32_0 = arith.constant 0 : i32
    return %arg0, %c0_i32 : i32, i32
  }
  func.func @transform_6(%arg0: i32) -> (i32, i32) {
    %c0_i32 = arith.constant 0 : i32
    %c0_i32_0 = arith.constant 0 : i32
    return %arg0, %c0_i32 : i32, i32
  }
  func.func @transform_7(%arg0: i32) -> (i32, i32) {
    %c0_i32 = arith.constant 0 : i32
    %c0_i32_0 = arith.constant 0 : i32
    return %arg0, %c0_i32 : i32, i32
  }
}

module attributes {stable_mosaic.version = 11 : i64} {
  func.func @_sdpa_kernel(%arg0: i32, %arg1: memref<4x32x16xbf16, #tpu.memory_space<vmem>>, %arg2: memref<4x32x16xbf16, #tpu.memory_space<vmem>>, %arg3: memref<4x32x16xbf16, #tpu.memory_space<vmem>>, %arg4: memref<4x32x16xbf16, #tpu.memory_space<vmem>>, %arg5: memref<4x32x32xf32, #tpu.memory_space<vmem>>) attributes {dimension_semantics = [#tpu.dimension_semantics<parallel>], iteration_bounds = array<i64: 2>, scalar_prefetch = 0 : i64, scratch_operands = 0 : i64, tpu.core_type = #tpu.core_type<tc>, window_params = [{transform_indices = @transform_0, window_bounds = array<i64: 4, 32, 16>}, {transform_indices = @transform_1, window_bounds = array<i64: 4, 32, 16>}, {transform_indices = @transform_2, window_bounds = array<i64: 4, 32, 16>}, {transform_indices = @transform_3, window_bounds = array<i64: 4, 32, 16>}, {transform_indices = @transform_4, window_bounds = array<i64: 4, 32, 32>}]} {
    %c0 = arith.constant 0 : index
    %c0_0 = arith.constant 0 : index
    %c0_1 = arith.constant 0 : index
    %0 = vector.load %arg1[%c0, %c0_0, %c0_1] : memref<4x32x16xbf16, #tpu.memory_space<vmem>>, vector<4x32x16xbf16>
    %c0_2 = arith.constant 0 : index
    %c0_3 = arith.constant 0 : index
    %c0_4 = arith.constant 0 : index
    %1 = vector.load %arg2[%c0_2, %c0_3, %c0_4] : memref<4x32x16xbf16, #tpu.memory_space<vmem>>, vector<4x32x16xbf16>
    %c0_5 = arith.constant 0 : index
    %c0_6 = arith.constant 0 : index
    %c0_7 = arith.constant 0 : index
    %2 = vector.load %arg3[%c0_5, %c0_6, %c0_7] : memref<4x32x16xbf16, #tpu.memory_space<vmem>>, vector<4x32x16xbf16>
    %cst = arith.constant dense<0.000000e+00> : vector<4x32x32xf32>
    %3 = tpu.matmul %0, %1, %cst {dimension_numbers = #tpu.dot_dimension_numbers<[2], [2], [1], [1], [0, 0, 0, 1, 1, 1], [0], [0]>} : vector<4x32x16xbf16>, vector<4x32x16xbf16>, vector<4x32x32xf32> -> vector<4x32x32xf32>
    %cst_8 = arith.constant dense<0xFF800000> : vector<4x32xf32>
    %4 = vector.multi_reduction <maximumf>, %3, %cst_8 [2] : vector<4x32x32xf32> to vector<4x32xf32>
    %5 = vector.shape_cast %4 : vector<4x32xf32> to vector<4x32x1xf32>
    %6 = vector.broadcast %5 : vector<4x32x1xf32> to vector<4x32x32xf32>
    %7 = arith.subf %3, %6 : vector<4x32x32xf32>
    %8 = math.exp %7 : vector<4x32x32xf32>
    %cst_9 = arith.constant dense<0.000000e+00> : vector<4x32xf32>
    %9 = vector.multi_reduction <add>, %8, %cst_9 [2] : vector<4x32x32xf32> to vector<4x32xf32>
    %10 = vector.shape_cast %9 : vector<4x32xf32> to vector<4x32x1xf32>
    %11 = tpu.reciprocal %10 : vector<4x32x1xf32> -> vector<4x32x1xf32>
    %12 = vector.broadcast %11 : vector<4x32x1xf32> to vector<4x32x32xf32>
    %13 = arith.mulf %8, %12 : vector<4x32x32xf32>
    %c0_10 = arith.constant 0 : index
    %c0_11 = arith.constant 0 : index
    %c0_12 = arith.constant 0 : index
    %14 = vector.load %arg5[%c0_10, %c0_11, %c0_12] : memref<4x32x32xf32, #tpu.memory_space<vmem>>, vector<4x32x32xf32>
    tpu.vector_store %arg5[%c0_10, %c0_11, %c0_12], %13 {strides = array<i32>} : memref<4x32x32xf32, #tpu.memory_space<vmem>>, vector<4x32x32xf32>,
    %15 = arith.truncf %13 : vector<4x32x32xf32> to vector<4x32x32xbf16>
    %cst_13 = arith.constant dense<0.000000e+00> : vector<4x32x16xf32>
    %16 = tpu.matmul %15, %2, %cst_13 {dimension_numbers = #tpu.dot_dimension_numbers<[2], [1], [1], [2], [0, 0, 0, 1, 1, 2], [0], [0]>} : vector<4x32x32xbf16>, vector<4x32x16xbf16>, vector<4x32x16xf32> -> vector<4x32x16xf32>
    %17 = arith.truncf %16 : vector<4x32x16xf32> to vector<4x32x16xbf16>
    %c0_14 = arith.constant 0 : index
    %c0_15 = arith.constant 0 : index
    %c0_16 = arith.constant 0 : index
    %18 = vector.load %arg4[%c0_14, %c0_15, %c0_16] : memref<4x32x16xbf16, #tpu.memory_space<vmem>>, vector<4x32x16xbf16>
    tpu.vector_store %arg4[%c0_14, %c0_15, %c0_16], %17 {strides = array<i32>} : memref<4x32x16xbf16, #tpu.memory_space<vmem>>, vector<4x32x16xbf16>,
    return
  }
  func.func @transform_0(%arg0: i32) -> (i32, i32, i32) {
    %c0_i32 = arith.constant 0 : i32
    %c0_i32_0 = arith.constant 0 : i32
    %c0_i32_1 = arith.constant 0 : i32
    return %arg0, %c0_i32, %c0_i32_0 : i32, i32, i32
  }
  func.func @transform_1(%arg0: i32) -> (i32, i32, i32) {
    %c0_i32 = arith.constant 0 : i32
    %c0_i32_0 = arith.constant 0 : i32
    %c0_i32_1 = arith.constant 0 : i32
    return %arg0, %c0_i32, %c0_i32_0 : i32, i32, i32
  }
  func.func @transform_2(%arg0: i32) -> (i32, i32, i32) {
    %c0_i32 = arith.constant 0 : i32
    %c0_i32_0 = arith.constant 0 : i32
    %c0_i32_1 = arith.constant 0 : i32
    return %arg0, %c0_i32, %c0_i32_0 : i32, i32, i32
  }
  func.func @transform_3(%arg0: i32) -> (i32, i32, i32) {
    %c0_i32 = arith.constant 0 : i32
    %c0_i32_0 = arith.constant 0 : i32
    %c0_i32_1 = arith.constant 0 : i32
    return %arg0, %c0_i32, %c0_i32_0 : i32, i32, i32
  }
  func.func @transform_4(%arg0: i32) -> (i32, i32, i32) {
    %c0_i32 = arith.constant 0 : i32
    %c0_i32_0 = arith.constant 0 : i32
    %c0_i32_1 = arith.constant 0 : i32
    return %arg0, %c0_i32, %c0_i32_0 : i32, i32, i32
  }
}

module attributes {stable_mosaic.version = 11 : i64} {
  func.func @_final_kernel(%arg0: i32, %arg1: memref<16x64xbf16, #tpu.memory_space<vmem>>, %arg2: memref<64x64xbf16, #tpu.memory_space<vmem>>, %arg3: memref<1x64xf32, #tpu.memory_space<vmem>>, %arg4: memref<16x64xf32, #tpu.memory_space<vmem>>, %arg5: memref<1x64xf32, #tpu.memory_space<vmem>>, %arg6: memref<1x64xf32, #tpu.memory_space<vmem>>, %arg7: memref<16x64xf32, #tpu.memory_space<vmem>>) attributes {dimension_semantics = [#tpu.dimension_semantics<parallel>], iteration_bounds = array<i64: 4>, scalar_prefetch = 0 : i64, scratch_operands = 0 : i64, tpu.core_type = #tpu.core_type<tc>, window_params = [{transform_indices = @transform_0, window_bounds = array<i64: 16, 64>}, {pipeline_mode = #tpu.pipeline_mode<synchronous>, transform_indices = @transform_1, window_bounds = array<i64: 64, 64>}, {pipeline_mode = #tpu.pipeline_mode<synchronous>, transform_indices = @transform_2, window_bounds = array<i64: 1, 64>}, {transform_indices = @transform_3, window_bounds = array<i64: 16, 64>}, {pipeline_mode = #tpu.pipeline_mode<synchronous>, transform_indices = @transform_4, window_bounds = array<i64: 1, 64>}, {pipeline_mode = #tpu.pipeline_mode<synchronous>, transform_indices = @transform_5, window_bounds = array<i64: 1, 64>}, {transform_indices = @transform_6, window_bounds = array<i64: 16, 64>}]} {
    %c0 = arith.constant 0 : index
    %c0_0 = arith.constant 0 : index
    %0 = vector.load %arg1[%c0, %c0_0] : memref<16x64xbf16, #tpu.memory_space<vmem>>, vector<16x64xbf16>
    %c0_1 = arith.constant 0 : index
    %c0_2 = arith.constant 0 : index
    %1 = vector.load %arg2[%c0_1, %c0_2] : memref<64x64xbf16, #tpu.memory_space<vmem>>, vector<64x64xbf16>
    %cst = arith.constant dense<0.000000e+00> : vector<16x64xf32>
    %2 = tpu.matmul %0, %1, %cst {dimension_numbers = #tpu.dot_dimension_numbers<[1], [0], [0], [1], [0, 0, 1, 1], [], []>} : vector<16x64xbf16>, vector<64x64xbf16>, vector<16x64xf32> -> vector<16x64xf32>
    %c0_3 = arith.constant 0 : index
    %c0_4 = arith.constant 0 : index
    %3 = vector.load %arg3[%c0_3, %c0_4] : memref<1x64xf32, #tpu.memory_space<vmem>>, vector<1x64xf32>
    %4 = vector.broadcast %3 : vector<1x64xf32> to vector<16x64xf32>
    %5 = arith.addf %2, %4 : vector<16x64xf32>
    %c0_5 = arith.constant 0 : index
    %c0_6 = arith.constant 0 : index
    %6 = vector.load %arg4[%c0_5, %c0_6] : memref<16x64xf32, #tpu.memory_space<vmem>>, vector<16x64xf32>
    %7 = arith.addf %5, %6 : vector<16x64xf32>
    %cst_7 = arith.constant dense<0.000000e+00> : vector<16xf32>
    %8 = vector.multi_reduction <add>, %7, %cst_7 [1] : vector<16x64xf32> to vector<16xf32>
    %9 = vector.shape_cast %8 : vector<16xf32> to vector<16x1xf32>
    %cst_8 = arith.constant 6.400000e+01 : f32
    %10 = vector.broadcast %cst_8 : f32 to vector<16x1xf32>
    %11 = arith.divf %9, %10 : vector<16x1xf32>
    %12 = vector.broadcast %11 : vector<16x1xf32> to vector<16x64xf32>
    %13 = arith.subf %7, %12 : vector<16x64xf32>
    %14 = arith.mulf %13, %13 : vector<16x64xf32>
    %cst_9 = arith.constant dense<0.000000e+00> : vector<16xf32>
    %15 = vector.multi_reduction <add>, %14, %cst_9 [1] : vector<16x64xf32> to vector<16xf32>
    %16 = vector.shape_cast %15 : vector<16xf32> to vector<16x1xf32>
    %cst_10 = arith.constant 6.400000e+01 : f32
    %17 = vector.broadcast %cst_10 : f32 to vector<16x1xf32>
    %18 = arith.divf %16, %17 : vector<16x1xf32>
    %19 = vector.broadcast %11 : vector<16x1xf32> to vector<16x64xf32>
    %20 = arith.subf %7, %19 : vector<16x64xf32>
    %cst_11 = arith.constant 9.99999974E-6 : f32
    %21 = vector.broadcast %cst_11 : f32 to vector<16x1xf32>
    %22 = arith.addf %18, %21 : vector<16x1xf32>
    %23 = math.rsqrt %22 : vector<16x1xf32>
    %24 = vector.broadcast %23 : vector<16x1xf32> to vector<16x64xf32>
    %25 = arith.mulf %20, %24 : vector<16x64xf32>
    %c0_12 = arith.constant 0 : index
    %c0_13 = arith.constant 0 : index
    %26 = vector.load %arg5[%c0_12, %c0_13] : memref<1x64xf32, #tpu.memory_space<vmem>>, vector<1x64xf32>
    %27 = vector.broadcast %26 : vector<1x64xf32> to vector<16x64xf32>
    %28 = arith.mulf %25, %27 : vector<16x64xf32>
    %c0_14 = arith.constant 0 : index
    %c0_15 = arith.constant 0 : index
    %29 = vector.load %arg6[%c0_14, %c0_15] : memref<1x64xf32, #tpu.memory_space<vmem>>, vector<1x64xf32>
    %30 = vector.broadcast %29 : vector<1x64xf32> to vector<16x64xf32>
    %31 = arith.addf %28, %30 : vector<16x64xf32>
    %c0_16 = arith.constant 0 : index
    %c0_17 = arith.constant 0 : index
    %32 = vector.load %arg7[%c0_16, %c0_17] : memref<16x64xf32, #tpu.memory_space<vmem>>, vector<16x64xf32>
    tpu.vector_store %arg7[%c0_16, %c0_17], %31 {strides = array<i32>} : memref<16x64xf32, #tpu.memory_space<vmem>>, vector<16x64xf32>,
    return
  }
  func.func @transform_0(%arg0: i32) -> (i32, i32) {
    %c0_i32 = arith.constant 0 : i32
    %c0_i32_0 = arith.constant 0 : i32
    return %arg0, %c0_i32 : i32, i32
  }
  func.func @transform_1(%arg0: i32) -> (i32, i32) {
    %c0_i32 = arith.constant 0 : i32
    %c0_i32_0 = arith.constant 0 : i32
    %c0_i32_1 = arith.constant 0 : i32
    return %c0_i32, %c0_i32_0 : i32, i32
  }
  func.func @transform_2(%arg0: i32) -> (i32, i32) {
    %c0_i32 = arith.constant 0 : i32
    %c0_i32_0 = arith.constant 0 : i32
    %c0_i32_1 = arith.constant 0 : i32
    return %c0_i32, %c0_i32_0 : i32, i32
  }
  func.func @transform_3(%arg0: i32) -> (i32, i32) {
    %c0_i32 = arith.constant 0 : i32
    %c0_i32_0 = arith.constant 0 : i32
    return %arg0, %c0_i32 : i32, i32
  }
  func.func @transform_4(%arg0: i32) -> (i32, i32) {
    %c0_i32 = arith.constant 0 : i32
    %c0_i32_0 = arith.constant 0 : i32
    %c0_i32_1 = arith.constant 0 : i32
    return %c0_i32, %c0_i32_0 : i32, i32
  }
  func.func @transform_5(%arg0: i32) -> (i32, i32) {
    %c0_i32 = arith.constant 0 : i32
    %c0_i32_0 = arith.constant 0 : i32
    %c0_i32_1 = arith.constant 0 : i32
    return %c0_i32, %c0_i32_0 : i32, i32
  }
  func.func @transform_6(%arg0: i32) -> (i32, i32) {
    %c0_i32 = arith.constant 0 : i32
    %c0_i32_0 = arith.constant 0 : i32
    return %arg0, %c0_i32 : i32, i32
  }
}

</mosaic_0001>

<bundles_post_ra>
// kernel: multi_head_attention.5
= control target key start
LH: loop header
LB: loop body
LE: loop exit
PB: predicated region body
PF: predicated region fallthrough
CT: control target
= control target key end

     0   :  { %11 = vsyncpa [#allocation3], 0  ;;  %s805_s0 = inlined_call_operand.vmem [shape: bf16[64,64], index: 0, kind: input, shape index: {}]   ;;  %s806_s1 = inlined_call_operand.vmem [shape: bf16[64,64], index: 1, kind: input, shape index: {}]   ;;  %s807_s2 = inlined_call_operand.vmem [shape: f32[1,64], index: 2, kind: input, shape index: {}]   ;;  %s808_s3 = inlined_call_operand.vmem [shape: f32[64,64], index: 3, kind: input, shape index: {}]   ;;  %s809_s4 = inlined_call_operand.vmem [shape: f32[1,64], index: 4, kind: input, shape index: {}]   ;;  %s810_s5 = inlined_call_operand.vmem [shape: f32[1,64], index: 5, kind: input, shape index: {}]   ;;  %s811_s6 = inlined_call_operand.hbm [shape: f32[64,64], index: 6, kind: output, shape index: {}]  }
   0x1   :  { %13 = vsyncpa [#allocation3 + $0x1], 0  ;;  %s690_s21 = smov 0   ;;  %s692_s22 = smov 0  }
   0x2   :  { %s694_s23 = smov 0   ;;  %s696_s24 = smov 0  }
   0x3 LB: > { %s711_s25 = sadd.s32 4294967295, %s650_s24   ;;  %s496_s26 = sadd.s32 4294967294, %s650_s24   ;;  %s650_s24 = sphi %s696_s24, %s817_s24   ;;  %s646_s23 = sphi %s694_s23, %s816_s23   ;;  %s642_s22 = sphi %s692_s22, %s815_s22   ;;  %s638_s21 = sphi %s690_s21, %s814_s21  }
   0x4   : > { %s715_s27 = sadd.s32 1, %s650_s24   ;;  %s162_s28 = sadd.s32 1, %s646_s23 }
   0x5   : > { %s159_s29 = ssub.s32 %s650_s24, %s715_s27  ;;  %p172_p0 = scmp.ne.s32.totalorder %s646_s23, %s642_s22 }
   0x6   : > { %p160_p1 = scmp.eq.s32.totalorder %s159_s29, 0  ;;  %p173_p2 = scmp.eq.s32.totalorder %s711_s25, 3 }
   0x7   : > { %p178_p3 = scmp.ne.s32.totalorder %s642_s22, %s638_s21  ;;  %p179_p4 = scmp.eq.s32.totalorder %s496_s26, 3 }
   0x8   : > { %s726_s30 = scalar_select %p160_p1, %s646_s23, %s162_s28  }
   0x9   : > { %p728_p5 = por %p173_p2, %p172_p0  ;;  %p732_p6 = por %p179_p4, %p178_p3 }
   0xa   : > { %p499_p7 = scmp.ge.s32.totalorder %s650_s24, 1  ;;  %p227_p8 = scmp.lt.s32.totalorder %s650_s24, 5 }
   0xc   : > { %p228_p9 = pnand %p499_p7, %p227_p8 }
   0xd   : > { %s501_s11 = sshll.u32 (!%p228_p9), %s711_s25, 1  ;;  %s536_s19 = sshll.u32 (!%p228_p9), %s711_s25, 4 }
   0xe   : > { %231 = sbr.rel (%p228_p9) target bundleno = 445 (0x1bd), region = 44  ;;  %p263_p10 = scmp.lt.s32.totalorder (!%p228_p9), %s501_s11, 7 }
  0x13   : > { %v535_v0 = vld [vmem:[%s806_s1 + $0x18] sm:$0xff]  ;;  %v534_v1 = vld [vmem:[%s806_s1 + $0x10] sm:$0xff]  ;;  %s819_s11 = smov (!%p263_p10, %s501_s11), 7  ;;  %v533_v2 = vld [vmem:[%s806_s1 + $0x8] sm:$0xff]  ;;  %vm319_vm0 = vcmask 523264   ;;  %v652_v16 = vmov 64.0  }
  0x14   : > { %327 = vmatpush.bf16.msra.mxu0 %v535_v0  ;;  %s502_s16 = sshll.u32 %s819_s11, 2  ;;  %v532_v3 = vld [vmem:[%s806_s1] sm:$0xff]  ;;  %s504_s28 = sshll.u32 %s819_s11, 3  ;;  %582 = vrcp.f32 %v652_v16 }
  0x15   : > { %s266_s26 = scalar_lea.vmem %s805_s0, %s502_s16  ;;  %v579_v5 = vld [vmem:[%s807_s2] ss:$0 sm:$0xff]  ;;  %s272_s13 = scalar_lea.vmem %s808_s3, %s504_s28 }
  0x16   : > { %v531_v4 = vld [vmem:[%s266_s26] sm:$0xff]  ;;  %v338_v12 = vld [vmem:[%s272_s13 + $0x8] sm:$0xff]  ;;  %s259_s11 = sand.u32 1, %s642_s22   ;;  %s418_s28 = scalar_lea.hbm %s811_s6, %s536_s19 }
  0x17   : > { %v337_v7 = vld [vmem:[%s272_s13] sm:$0xff]  ;;  %s500_s18 = sshll.u32 %s259_s11, 4  ;;  %s421_s10 = sshll.u32 %s418_s28, 4  ;;  %s422_s10 = int_to_ptr.hbm [resolvable:$true] %s421_s10 }
  0x18   : > { %328 = vmatpush.bf16.msra.mxu0 %v534_v1  ;;  %v580_v47 = vld [vmem:[%s809_s4] ss:$0 sm:$0xff]  ;;  %s261_s29 = scalar_lea.vmem [#allocation2], %s500_s18  ;;  %s407_s25 = scalar_lea.sflag [#allocation3], %s259_s11 }
  0x19   : > { %v581_v50 = vld [vmem:[%s810_s5] ss:$0 sm:$0xff]  ;;  %s419_s9 = sshll.u32 %s261_s29, 4  ;;  %s602_s12 = sshra.s32 %s422_s10, 4  ;;  %s420_s9 = int_to_ptr.vmem [resolvable:$true] %s419_s9  ;;  %s603_s12 = int_to_ptr.hbm [resolvable:$true] %s602_s12 }
  0x1a   : > { %v583_v17 = vpop.eup %582  ;;  %s604_s13 = scalar_lea.hbm %s603_s12, 16  ;;  %s608_s16 = scalar_lea.hbm %s811_s6, 64 }
  0x1b   : > { %v348_v18 = vmul.f32 64.0, %v583_v17  ;;  %vm352_vm1 = vweird.f32 %v583_v17  ;;  %p605_p11 = scmp.ne.s32.totalorder %s603_s12, %s604_s13  ;;  %p609_p0 = scmp.lt.s32.totalorder %s603_s12, %s811_s6 }
  0x1c   : > { %329 = vmatpush.bf16.msra.mxu0 %v533_v2  ;;  %p610_p1 = scmp.lt.s32.totalorder %s608_s16, %s604_s13 }
  0x1d   : > { %v349_v19 = vsub.f32 1.0, %v348_v18  ;;  %p606_p12 = pnand %p605_p11, %p728_p5 }
  0x1e   : > { %p611_p2 = por %p610_p1, %p609_p0 }
  0x1f   : > { %v350_v20 = vmul.f32 %v583_v17, %v349_v19  ;;  %p607_p13 = pneg %p606_p12 }
  0x20   : > { %330 = vmatpush.bf16.msra.mxu0 %v532_v3 }
  0x21   : > { %v351_v21 = vadd.f32 %v583_v17, %v350_v20  ;;  %p612_p3 = pnand %p611_p2, %p607_p13 }
  0x23   : > { %525 = vmatmul.msk.bf16.vlgmr.msra.gmra.mxu0 %vm319_vm0, %v531_v4  ;;  %v353_v22 = vsel %vm352_vm1, %v583_v17, %v351_v21 }
  0xa0   : > { %v332_v6 = vpop.f32.mrf.mxu0 }
  0xa1   : > { %v333_v8 = vadd.f32 %v579_v5, %v332_v6 }
  0xa3   : > { %v339_v9 = vadd.f32 %v337_v7, %v333_v8 }
  0xa5   : > { %v341_v10 = vsel %vm319_vm0, %v339_v9, 0.0 }
  0xa6   : > { %342 = vadd.xlane.f32.xlu0 %v341_v10 }
  0xa8   : > { %v334_v11 = vpop.f32.mrf.mxu0 }
  0xa9   : > { %v335_v13 = vadd.f32 %v579_v5, %v334_v11 }
  0xab   : > { %v340_v14 = vadd.f32 %v338_v12, %v335_v13 }
  0xad   : > { %v344_v15 = vsel %vm319_vm0, %v340_v14, 0.0 }
  0xae   : > { %345 = vadd.xlane.f32.xlu0 %v344_v15 }
 0x119   : > { %v343_v23 = vpop.xlane.xlu0 %342 }
 0x11a   : > { %v354_v24 = vmul.f32 %v353_v22, %v343_v23 }
 0x11c   : > { %v356_v25 = vsub.f32 %v339_v9, %v354_v24 }
 0x11e   : > { %v358_v26 = vmul.f32 %v356_v25, %v356_v25 }
 0x120   : > { %v360_v27 = vsel %vm319_vm0, %v358_v26, 0.0 }
 0x121   : > { %361 = vadd.xlane.f32.xlu1 %v360_v27  ;;  %v346_v28 = vpop.xlane.xlu0 %345 }
 0x122   : > { %v355_v29 = vmul.f32 %v353_v22, %v346_v28 }
 0x124   : > { %v357_v30 = vsub.f32 %v340_v14, %v355_v29 }
 0x126   : > { %v359_v31 = vmul.f32 %v357_v30, %v357_v30 }
 0x128   : > { %v363_v32 = vsel %vm319_vm0, %v359_v31, 0.0 }
 0x129   : > { %364 = vadd.xlane.f32.xlu1 %v363_v32 }
 0x194   : > { %v362_v33 = vpop.xlane.xlu1 %361 }
 0x195   : > { %v366_v34 = vmul.f32 %v362_v33, %v353_v22 }
 0x197   : > { %v368_v35 = vadd.f32 1e-05, %v366_v34 }
 0x199   : > { %584 = vrsqrt.f32 %v368_v35  ;;  %vm376_vm3 = vweird.f32 %v368_v35 }
 0x19c   : > { %v365_v36 = vpop.xlane.xlu1 %364 }
 0x19d   : > { %v367_v37 = vmul.f32 %v365_v36, %v353_v22 }
 0x19f   : > { %v585_v38 = vpop.eup %584  ;;  %v369_v39 = vadd.f32 1e-05, %v367_v37 }
 0x1a0   : > { %v371_v40 = vmul.f32 %v585_v38, %v368_v35  ;;  %vm377_vm2 = vweird.f32 %v585_v38 }
 0x1a1   : > { %586 = vrsqrt.f32 %v369_v39  ;;  %vm378_vm4 = vmor %vm376_vm3, %vm377_vm2  ;;  %vm386_vm6 = vweird.f32 %v369_v39 }
 0x1a2   : > { %v372_v41 = vmul.f32 %v585_v38, %v371_v40 }
 0x1a4   : > { %v373_v42 = vmul.f32 0.5, %v372_v41 }
 0x1a6   : > { %v374_v43 = vsub.f32 1.5, %v373_v42 }
 0x1a7   : > { %v587_v44 = vpop.eup %586 }
 0x1a8   : > { %v375_v45 = vmul.f32 %v585_v38, %v374_v43  ;;  %v381_v46 = vmul.f32 %v587_v44, %v369_v39  ;;  %vm387_vm5 = vweird.f32 %v587_v44 }
 0x1a9   : > { %vm388_vm7 = vmor %vm386_vm6, %vm387_vm5 }
 0x1aa   : > { %v379_v48 = vsel %vm378_vm4, %v585_v38, %v375_v45  ;;  %v382_v49 = vmul.f32 %v587_v44, %v381_v46 }
 0x1ab   : > { %v390_v51 = vmul.f32 %v379_v48, %v356_v25 }
 0x1ac   : > { %v383_v52 = vmul.f32 0.5, %v382_v49 }
 0x1ad   : > { %v396_v53 = vmul.f32 %v580_v47, %v390_v51 }
 0x1ae   : > { %v384_v54 = vsub.f32 1.5, %v383_v52 }
 0x1af   : > { %v402_v55 = vadd.f32 %v581_v50, %v396_v53 }
 0x1b0   : > { %v385_v56 = vmul.f32 %v587_v44, %v384_v54 }
 0x1b1   : > { %404 = vst.msk [vmem:[%s261_s29] sm:$0xff] %vm319_vm0, %v402_v55 }
 0x1b2   : > { %v389_v57 = vsel %vm388_vm7, %v587_v44, %v385_v56 }
 0x1b3   : > { %v391_v58 = vmul.f32 %v389_v57, %v357_v30 }
 0x1b5   : > { %v397_v59 = vmul.f32 %v580_v47, %v391_v58 }
 0x1b7   : > { %v403_v60 = vadd.f32 %v581_v50, %v397_v59 }
 0x1b9   : > { %405 = vst.msk [vmem:[%s261_s29 + $0x8] sm:$0xff] %vm319_vm0, %v403_v60 }
 0x1ba   : > { %615 = shalt.err (!%p612_p3)
}
 0x1bb   : > { %s653_s11 = smov 128   ;;  %s654_s19 = smov 8  }
 0x1bc   : > { %537 = dma.vmem_to_hbm [thread:$0]  (%p728_p5), %s420_s9, 256, %s422_s10, %s407_s25, %s653_s11, %s653_s11, %s654_s19  }
 0x1bd PF: > { %p543_p4 = scmp.ge.s32.totalorder %s650_s24, 2  ;;  %s436_s20 = sand.u32 1, %s638_s21  }
 0x1be   : > { %s437_s26 = scalar_lea.sflag [#allocation3], %s436_s20 }
 0x1bf   : > { %p540_p7 = pnand %p543_p4, %p732_p6 }
 0x1c1   : > { %p541_p8 = pneg %p540_p7 }
 0x1c3   : > { %633 = dma.done.wait (%p541_p8), %s437_s26, 256  }
 0x1c4   : > { %635 = vsyncadd (%p541_p8), %s437_s26, 4294967040  ;;  %p16_p9 = scmp.ge.s32.totalorder %s715_s27, 6   ;;  %s814_s21 = smov %s642_s22 }
 0x1c5   : > { %s815_s22 = smov %s646_s23  ;;  %s816_s23 = smov %s726_s30 }
 0x1c6   : > { %s817_s24 = smov %s715_s27  ;;  %18 = sbr.rel (!%p16_p9) target bundleno = 3 (0x3), region = 82 }
 0x1cb   :  { %443 = vsyncpa [#allocation3], 1 }
 0x1cc   :  { %445 = vsyncpa [#allocation3 + $0x1], 1 }

// kernel: multi_head_attention.3
= control target key start
LH: loop header
LB: loop body
LE: loop exit
PB: predicated region body
PF: predicated region fallthrough
CT: control target
= control target key end

     0   :  { %s847_s24 = smov 0   ;;  %s931_s0 = inlined_call_operand.vmem [shape: f32[64,64], index: 0, kind: input, shape index: {}]   ;;  %s932_s1 = inlined_call_operand.vmem [shape: f32[64,64], index: 1, kind: input, shape index: {}]   ;;  %s933_s2 = inlined_call_operand.vmem [shape: f32[64,64], index: 2, kind: input, shape index: {}]   ;;  %s934_s3 = inlined_call_operand.vmem [shape: bf16[3,64,64], index: 3, kind: input, shape index: {}]   ;;  %s935_s4 = inlined_call_operand.vmem [shape: f32[3,1,64], index: 4, kind: input, shape index: {}]   ;;  %s936_s5 = inlined_call_operand.vmem [shape: bf16[64,64], index: 5, kind: output, shape index: {0}]   ;;  %s937_s6 = inlined_call_operand.vmem [shape: bf16[64,64], index: 6, kind: output, shape index: {1}]   ;;  %s938_s7 = inlined_call_operand.vmem [shape: bf16[64,64], index: 7, kind: output, shape index: {2}]  }
   0x1 LB: > { %s688_s25 = sadd.s32 4294967295, %s805_s24   ;;  %p692_p0 = scmp.ge.s32.totalorder %s805_s24, 1  ;;  %s805_s24 = sphi %s847_s24, %s18_s24  }
   0x2   : > { %p265_p1 = scmp.lt.s32.totalorder %s805_s24, 5 }
   0x4   : > { %p266_p2 = pnand %p692_p0, %p265_p1 }
   0x5   : > { %s693_s9 = sshll.u32 (!%p266_p2), %s688_s25, 1 }
   0x6   : > { %269 = sbr.rel (%p266_p2) target bundleno = 174 (0xae), region = 40  ;;  %p318_p3 = scmp.lt.s32.totalorder (!%p266_p2), %s693_s9, 7 }
   0xb   : > { %v779_v0 = vld [vmem:[%s934_s3 + $0x18] sm:$0xff]  ;;  %v778_v3 = vld [vmem:[%s934_s3 + $0x10] sm:$0xff]  ;;  %s940_s9 = smov (!%p318_p3, %s693_s9), 7  ;;  %v777_v6 = vld [vmem:[%s934_s3 + $0x8] sm:$0xff]  ;;  %vm393_vm0 = vcmask 523264   ;;  %vm413_vm1 = vcmask 519168  }
   0xc   : > { %v783_v1 = vld [vmem:[%s934_s3 + $0x38] sm:$0xff]  ;;  %401 = vmatpush.bf16.msra.mxu0 %v779_v0  ;;  %v782_v4 = vld [vmem:[%s934_s3 + $0x30] sm:$0xff]  ;;  %s694_s16 = sshll.u32 %s940_s9, 3  ;;  %v781_v7 = vld [vmem:[%s934_s3 + $0x28] sm:$0xff]  ;;  %s700_s21 = sshll.u32 %s940_s9, 2 }
   0xd   : > { %v787_v2 = vld [vmem:[%s934_s3 + $0x58] sm:$0xff]  ;;  %464 = vmatpush.bf16.msra.mxu1 %v783_v1  ;;  %v786_v5 = vld [vmem:[%s934_s3 + $0x50] sm:$0xff]  ;;  %s321_s23 = scalar_lea.vmem %s931_s0, %s694_s16  ;;  %v785_v8 = vld [vmem:[%s934_s3 + $0x48] sm:$0xff]  ;;  %s327_s29 = scalar_lea.vmem %s932_s1, %s694_s16 }
   0xe   : > { %526 = vmatpush.bf16.msra.mxu2 %v787_v2  ;;  %s333_s10 = scalar_lea.vmem %s933_s2, %s694_s16  ;;  %v776_v9 = vld [vmem:[%s934_s3] sm:$0xff]  ;;  %v355_v12 = vld [vmem:[%s321_s23 + $0x8] sm:$0xff]  ;;  %s339_s25 = scalar_lea.vmem %s936_s5, %s700_s21 }
   0xf   : > { %v780_v10 = vld [vmem:[%s934_s3 + $0x20] sm:$0xff]  ;;  %v417_v14 = vld [vmem:[%s327_s29 + $0x8] sm:$0xff]  ;;  %s345_s28 = scalar_lea.vmem %s937_s6, %s700_s21 }
  0x10   : > { %402 = vmatpush.bf16.msra.mxu0 %v778_v3  ;;  %v354_v11 = vld [vmem:[%s321_s23] sm:$0xff]  ;;  %v479_v17 = vld [vmem:[%s333_s10 + $0x8] sm:$0xff] }
  0x11   : > { %465 = vmatpush.bf16.msra.mxu1 %v782_v4  ;;  %v416_v13 = vld [vmem:[%s327_s29] sm:$0xff]  ;;  %v356_v18 = vpack.c.bf16 %v355_v12, %v354_v11 }
  0x12   : > { %527 = vmatpush.bf16.msra.mxu2 %v786_v5  ;;  %v784_v15 = vld [vmem:[%s934_s3 + $0x40] sm:$0xff]  ;;  %v418_v19 = vpack.c.bf16 %v417_v14, %v416_v13 }
  0x13   : > { %v478_v16 = vld [vmem:[%s333_s10] sm:$0xff]  ;;  %s351_s10 = scalar_lea.vmem %s938_s7, %s700_s21 }
  0x14   : > { %403 = vmatpush.bf16.msra.mxu0 %v777_v6  ;;  %v480_v20 = vpack.c.bf16 %v479_v17, %v478_v16  ;;  %v796_v21 = vld [vmem:[%s935_s4] ss:$0 sm:$0xff]  ;;  %v797_v22 = vld [vmem:[%s935_s4 + $0x1] ss:$0 sm:$0xff]  ;;  %v798_v29 = vld [vmem:[%s935_s4 + $0x2] ss:$0 sm:$0xff] }
  0x15   : > { %466 = vmatpush.bf16.msra.mxu1 %v781_v7 }
  0x16   : > { %528 = vmatpush.bf16.msra.mxu2 %v785_v8 }
  0x18   : > { %404 = vmatpush.bf16.msra.mxu0 %v776_v9 }
  0x19   : > { %467 = vmatpush.bf16.msra.mxu1 %v780_v10 }
  0x1a   : > { %529 = vmatpush.bf16.msra.mxu2 %v784_v15 }
  0x1b   : > { %721 = vmatmul.msk.bf16.vlgmr.msra.gmra.mxu0 %vm393_vm0, %v356_v18 }
  0x1c   : > { %747 = vmatmul.msk.bf16.vlgmr.msra.gmra.mxu1 %vm393_vm0, %v418_v19 }
  0x1d   : > { %773 = vmatmul.msk.bf16.vlgmr.msra.gmra.mxu2 %vm393_vm0, %v480_v20 }
  0x98   : > { %v406_v23 = vpop.f32.mrf.mxu0 }
  0x99   : > { %v469_v24 = vpop.f32.mrf.mxu1  ;;  %v407_v25 = vadd.f32 %v796_v21, %v406_v23 }
  0x9a   : > { %v470_v26 = vadd.f32 %v797_v22, %v469_v24 }
  0x9b   : > { %v411_v27 = vpack.c.bf16 %v407_v25, %v407_v25 }
  0x9c   : > { %v474_v28 = vpack.c.bf16 %v470_v26, %v470_v26 }
  0x9d   : > { %414 = vst.msk [vmem:[%s339_s25] sm:$0xf] %vm413_vm1, %v411_v27 }
  0x9e   : > { %476 = vst.msk [vmem:[%s345_s28] sm:$0xf] %vm413_vm1, %v474_v28 }
  0xa0   : > { %v531_v30 = vpop.f32.mrf.mxu2  ;;  %v408_v32 = vpop.f32.mrf.mxu0 }
  0xa1   : > { %v532_v31 = vadd.f32 %v798_v29, %v531_v30  ;;  %v471_v33 = vpop.f32.mrf.mxu1  ;;  %v409_v34 = vadd.f32 %v796_v21, %v408_v32 }
  0xa2   : > { %v472_v35 = vadd.f32 %v797_v22, %v471_v33 }
  0xa3   : > { %v536_v36 = vpack.c.bf16 %v532_v31, %v532_v31  ;;  %v412_v37 = vpack.c.bf16 %v409_v34, %v409_v34 }
  0xa4   : > { %v475_v38 = vpack.c.bf16 %v472_v35, %v472_v35 }
  0xa5   : > { %538 = vst.msk [vmem:[%s351_s10] sm:$0xf] %vm413_vm1, %v536_v36 }
  0xa6   : > { %415 = vst.msk [vmem:[%s339_s25 + $0x4] sm:$0xf] %vm413_vm1, %v412_v37 }
  0xa7   : > { %477 = vst.msk [vmem:[%s345_s28 + $0x4] sm:$0xf] %vm413_vm1, %v475_v38 }
  0xa8   : > { %v533_v39 = vpop.f32.mrf.mxu2 }
  0xa9   : > { %v534_v40 = vadd.f32 %v798_v29, %v533_v39 }
  0xab   : > { %v537_v41 = vpack.c.bf16 %v534_v40, %v534_v40 }
  0xad   : > { %539 = vst.msk [vmem:[%s351_s10 + $0x4] sm:$0xf] %vm413_vm1, %v537_v41 }
  0xae PF: > { %s18_s24 = sadd.s32 1, %s805_s24  }
  0xaf   : > { %p15_p4 = scmp.ge.s32.totalorder %s18_s24, 6  }
  0xb1   :  { %17 = sbr.rel (!%p15_p4) target bundleno = 1 (0x1), region = 104 }

// kernel: multi_head_attention.4
= control target key start
LH: loop header
LB: loop body
LE: loop exit
PB: predicated region body
PF: predicated region fallthrough
CT: control target
= control target key end

     0   :  { %10 = vsyncpa [#allocation3], 0  ;;  %s2509_s0 = inlined_call_operand.vmem [shape: bf16[8,32,16], index: 0, kind: input, shape index: {}]   ;;  %s2510_s1 = inlined_call_operand.vmem [shape: bf16[8,32,16], index: 1, kind: input, shape index: {}]   ;;  %s2511_s2 = inlined_call_operand.vmem [shape: bf16[8,32,16], index: 2, kind: input, shape index: {}]   ;;  %s2512_s3 = inlined_call_operand.vmem [shape: bf16[8,32,16], index: 3, kind: output, shape index: {0}]   ;;  %s2513_s4 = inlined_call_operand.hbm [shape: f32[8,32,32], index: 4, kind: output, shape index: {1}]  }
   0x1   :  { %12 = vsyncpa [#allocation3 + $0x1], 0  ;;  %s1660_s15 = smov 0   ;;  %s1662_s16 = smov 0  }
   0x2   :  { %s1664_s17 = smov 0   ;;  %s1666_s18 = smov 0  }
   0x3 LB: > { %s1681_s19 = sadd.s32 4294967295, %s1631_s18   ;;  %s1299_s20 = sadd.s32 4294967294, %s1631_s18   ;;  %s1631_s18 = sphi %s1666_s18, %s2606_s18   ;;  %s1627_s17 = sphi %s1664_s17, %s2605_s17   ;;  %s1623_s16 = sphi %s1662_s16, %s2604_s16   ;;  %s1619_s15 = sphi %s1660_s15, %s2603_s15  }
   0x4   : > { %s1685_s21 = sadd.s32 1, %s1631_s18   ;;  %s129_s22 = sadd.s32 1, %s1627_s17 }
   0x5   : > { %s126_s23 = ssub.s32 %s1631_s18, %s1685_s21  ;;  %p139_p0 = scmp.ne.s32.totalorder %s1627_s17, %s1623_s16 }
   0x6   : > { %p127_p1 = scmp.eq.s32.totalorder %s126_s23, 0  ;;  %p140_p2 = scmp.eq.s32.totalorder %s1681_s19, 1 }
   0x7   : > { %p145_p3 = scmp.ne.s32.totalorder %s1623_s16, %s1619_s15  ;;  %p146_p4 = scmp.eq.s32.totalorder %s1299_s20, 1 }
   0x8   : > { %s1696_s24 = scalar_select %p127_p1, %s1627_s17, %s129_s22  }
   0x9   : > { %p1698_p5 = por %p140_p2, %p139_p0  ;;  %p1702_p6 = por %p146_p4, %p145_p3 }
   0xa   : > { %p1302_p7 = scmp.ge.s32.totalorder %s1631_s18, 1  ;;  %p194_p8 = scmp.lt.s32.totalorder %s1631_s18, 3 }
   0xc   : > { %p195_p9 = pnand %p1302_p7, %p194_p8 }
   0xd   : > { %s1304_s27 = sshll.u32 (!%p195_p9), %s1681_s19, 2  ;;  %s236_s12 = sand.u32 (!%p195_p9), 1, %s1623_s16  }
   0xe   : > { %198 = sbr.rel (%p195_p9) target bundleno = 634 (0x27a), region = 32  ;;  %p240_p10 = scmp.lt.s32.totalorder (!%p195_p9), %s1304_s27, 7 }
   0xf   : > { %s1303_s13 = sshll.u32 (!%p195_p9), %s236_s12, 7  ;;  %s1463_s20 = sshll.u32 (!%p195_p9), %s1681_s19, 7 }
  0x10   : > { %s1948_s14 = scalar_lea.vmem (!%p195_p9), [#allocation2], %s1303_s13  ;;  %s1183_s29 = scalar_lea.hbm (!%p195_p9), %s2513_s4, %s1463_s20 }
  0x11   : > { %s1184_s22 = sshll.u32 (!%p195_p9), %s1948_s14, 4  ;;  %s1186_s30 = sshll.u32 (!%p195_p9), %s1183_s29, 4  ;;  %s1185_s22 = int_to_ptr.vmem [resolvable:$true] %s1184_s22  ;;  %s1187_s30 = int_to_ptr.hbm [resolvable:$true] %s1186_s30 }
  0x12   : > { %s1583_s6 = sshra.s32 (!%p195_p9), %s1187_s30, 4  ;;  %s1589_s19 = scalar_lea.hbm (!%p195_p9), %s2513_s4, 256  ;;  %s1584_s6 = int_to_ptr.hbm [resolvable:$true] %s1583_s6 }
  0x13   : > { %s2608_s27 = smov (!%p240_p10, %s1304_s27), 7  ;;  %vm337_vm0 = vcmask 130048   ;;  %vm2514_vm1 = vcmask 261120   ;;  %s1585_s7 = scalar_lea.hbm %s1584_s6, 128 }
  0x14   : > { %s1709_s28 = sshll.u32 %s2608_s27, 4  ;;  %p1586_p11 = scmp.ne.s32.totalorder %s1584_s6, %s1585_s7 }
  0x15   : > { %s251_s5 = scalar_lea.vmem %s2510_s1, %s1709_s28  ;;  %s244_s8 = scalar_lea.vmem %s2509_s0, %s1709_s28 }
  0x16   : > { %v1447_v0 = vld [vmem:[%s251_s5 + $0x8] sm:$0xff]  ;;  %v1449_v1 = vld [vmem:[%s251_s5 + $0x18] sm:$0xff]  ;;  %v1446_v8 = vld [vmem:[%s251_s5] sm:$0xff]  ;;  %s1863_s11 = scalar_lea.vmem %s2511_s2, %s1709_s28  ;;  %p1587_p12 = pnand %p1586_p11, %p1698_p5 }
  0x17   : > { %v1451_v2 = vld [vmem:[%s251_s5 + $0x28] sm:$0xff]  ;;  %v1453_v3 = vld [vmem:[%s251_s5 + $0x38] sm:$0xff]  ;;  %v348_v4 = vsel %vm337_vm0, %v1447_v0, 0  ;;  %v399_v5 = vsel %vm337_vm0, %v1449_v1, 0  ;;  %v1448_v9 = vld [vmem:[%s251_s5 + $0x10] sm:$0xff]  ;;  %v345_v12 = vsel %vm337_vm0, %v1446_v8, 0  ;;  %p1590_p0 = scmp.lt.s32.totalorder %s1584_s6, %s2513_s4  ;;  %p1591_p1 = scmp.lt.s32.totalorder %s1589_s19, %s1585_s7 }
  0x18   : > { %v450_v6 = vsel %vm337_vm0, %v1451_v2, 0  ;;  %356 = vmatpush.bf16.xpose.msra.mxu0 %v348_v4  ;;  %407 = vmatpush.bf16.xpose.msra.mxu1 %v399_v5  ;;  %v501_v7 = vsel %vm337_vm0, %v1453_v3, 0  ;;  %v1450_v10 = vld [vmem:[%s251_s5 + $0x20] sm:$0xff]  ;;  %v1452_v11 = vld [vmem:[%s251_s5 + $0x30] sm:$0xff]  ;;  %v396_v13 = vsel %vm337_vm0, %v1448_v9, 0  ;;  %v1439_v20 = vld [vmem:[%s244_s8 + $0x8] sm:$0xff]  ;;  %p1588_p13 = pneg %p1587_p12 }
  0x19   : > { %458 = vmatpush.bf16.xpose.msra.mxu2 %v450_v6  ;;  %509 = vmatpush.bf16.xpose.msra.mxu3 %v501_v7  ;;  %v447_v14 = vsel %vm337_vm0, %v1450_v10, 0  ;;  %v498_v15 = vsel %vm337_vm0, %v1452_v11, 0  ;;  %v1438_v16 = vld [vmem:[%s244_s8] sm:$0xff]  ;;  %v1440_v17 = vld [vmem:[%s244_s8 + $0x10] sm:$0xff]  ;;  %v1441_v21 = vld [vmem:[%s244_s8 + $0x18] sm:$0xff]  ;;  %s1167_s5 = scalar_lea.sflag [#allocation3], %s236_s12  ;;  %p1592_p2 = por %p1591_p1, %p1590_p0 }
  0x1a   : > { %v1442_v18 = vld [vmem:[%s244_s8 + $0x20] sm:$0xff]  ;;  %v1444_v19 = vld [vmem:[%s244_s8 + $0x30] sm:$0xff]  ;;  %v1443_v22 = vld [vmem:[%s244_s8 + $0x28] sm:$0xff] }
  0x1b   : > { %v1445_v23 = vld [vmem:[%s244_s8 + $0x38] sm:$0xff]  ;;  %p1593_p3 = pnand %p1592_p2, %p1588_p13 }
  0x20   : > { %357 = vmatpush.bf16.xpose.msra.mxu0 %v345_v12  ;;  %408 = vmatpush.bf16.xpose.msra.mxu1 %v396_v13 }
  0x21   : > { %459 = vmatpush.bf16.xpose.msra.mxu2 %v447_v14  ;;  %510 = vmatpush.bf16.xpose.msra.mxu3 %v498_v15 }
  0x27   : > { %1332 = vmatmul.msk.bf16.vlgmr.msra.gmra.mxu0 %vm337_vm0, %v1438_v16  ;;  %1350 = vmatmul.msk.bf16.vlgmr.msra.gmra.mxu1 %vm337_vm0, %v1440_v17 }
  0x28   : > { %1368 = vmatmul.msk.bf16.vlgmr.msra.gmra.mxu2 %vm337_vm0, %v1442_v18  ;;  %1386 = vmatmul.msk.bf16.vlgmr.msra.gmra.mxu3 %vm337_vm0, %v1444_v19 }
  0x37   : > { %1333 = vmatmul.msk.bf16.gmra.mxu0 %vm337_vm0, %v1439_v20  ;;  %1351 = vmatmul.msk.bf16.gmra.mxu1 %vm337_vm0, %v1441_v21 }
  0x38   : > { %1369 = vmatmul.msk.bf16.gmra.mxu2 %vm337_vm0, %v1443_v22  ;;  %1387 = vmatmul.msk.bf16.gmra.mxu3 %vm337_vm0, %v1445_v23 }
  0xa4   : > { %v359_v24 = vpop.f32.mrf.mxu0  ;;  %v410_v25 = vpop.f32.mrf.mxu1 }
  0xa5   : > { %v535_v26 = vsel %vm2514_vm1, %v410_v25, -inf  ;;  %v523_v27 = vsel %vm2514_vm1, %v359_v24, -inf }
  0xa6   : > { %536 = vmax.xlane.f32.xlu0 %v535_v26  ;;  %524 = vmax.xlane.f32.xlu2 %v523_v27 }
  0xab   : > { %v461_v28 = vpop.f32.mrf.mxu2  ;;  %v512_v29 = vpop.f32.mrf.mxu3 }
  0xac   : > { %v559_v30 = vsel %vm2514_vm1, %v512_v29, -inf  ;;  %v361_v31 = vpop.f32.mrf.mxu0  ;;  %v547_v32 = vsel %vm2514_vm1, %v461_v28, -inf  ;;  %v1748_v38 = vpop.f32.mrf.mxu1 }
  0xad   : > { %560 = vmax.xlane.f32.xlu1 %v559_v30  ;;  %v526_v33 = vsel %vm2514_vm1, %v361_v31, -inf  ;;  %v538_v43 = vsel %vm2514_vm1, %v1748_v38, -inf }
  0xae   : > { %548 = vmax.xlane.f32.xlu0 %v547_v32  ;;  %527 = vmax.xlane.f32.xlu2 %v526_v33 }
  0xb3   : > { %v1740_v34 = vpop.f32.mrf.mxu2  ;;  %v1742_v35 = vpop.f32.mrf.mxu3 }
  0xb4   : > { %v562_v36 = vsel %vm2514_vm1, %v1742_v35, -inf  ;;  %v550_v37 = vsel %vm2514_vm1, %v1740_v34, -inf  ;;  %v1750_v39 = vpop.f32.mrf.mxu0  ;;  %v1762_v45 = vpop.f32.mrf.mxu1 }
  0xb5   : > { %563 = vmax.xlane.f32.xlu1 %v562_v36  ;;  %v529_v42 = vsel %vm2514_vm1, %v1750_v39, -inf  ;;  %v541_v53 = vsel %vm2514_vm1, %v1762_v45, -inf }
  0xb6   : > { %551 = vmax.xlane.f32.xlu0 %v550_v37 }
  0xbb   : > { %v1752_v40 = vpop.f32.mrf.mxu2  ;;  %v1754_v41 = vpop.f32.mrf.mxu3 }
  0xbc   : > { %v553_v44 = vsel %vm2514_vm1, %v1752_v40, -inf  ;;  %v565_v48 = vsel %vm2514_vm1, %v1754_v41, -inf  ;;  %v1774_v51 = vpop.f32.mrf.mxu0  ;;  %v1776_v52 = vpop.f32.mrf.mxu1 }
  0xbd   : > { %539 = vmax.xlane.f32.xlu1 %v538_v43  ;;  %554 = vmax.xlane.f32.xlu2 %v553_v44  ;;  %v532_v54 = vsel %vm2514_vm1, %v1774_v51, -inf  ;;  %v544_v55 = vsel %vm2514_vm1, %v1776_v52, -inf }
  0xbe   : > { %530 = vmax.xlane.f32.xlu0 %v529_v42 }
  0xc3   : > { %v1764_v46 = vpop.f32.mrf.mxu2  ;;  %v1766_v47 = vpop.f32.mrf.mxu3 }
  0xc4   : > { %v568_v49 = vsel %vm2514_vm1, %v1766_v47, -inf  ;;  %v556_v50 = vsel %vm2514_vm1, %v1764_v46, -inf }
  0xc5   : > { %566 = vmax.xlane.f32.xlu1 %v565_v48  ;;  %569 = vmax.xlane.f32.xlu2 %v568_v49 }
  0xc6   : > { %557 = vmax.xlane.f32.xlu0 %v556_v50 }
  0xcd   : > { %542 = vmax.xlane.f32.xlu2 %v541_v53  ;;  %533 = vmax.xlane.f32.xlu1 %v532_v54 }
  0xce   : > { %545 = vmax.xlane.f32.xlu0 %v544_v55 }
 0x119   : > { %v537_v56 = vpop.xlane.xlu0 %536  ;;  %v525_v57 = vpop.xlane.xlu2 %524 }
 0x11a   : > { %v575_v58 = vsub.f32 %v410_v25, %v537_v56  ;;  %v571_v59 = vsub.f32 %v359_v24, %v525_v57 }
 0x11c   : > { %v595_v60 = vmul.f32 1.442695, %v575_v58  ;;  %v587_v61 = vmul.f32 1.442695, %v571_v59 }
 0x11e   : > { %1505 = vpow2.f32 %v595_v60 }
 0x11f   : > { %1507 = vpow2.f32 %v587_v61 }
 0x120   : > { %v561_v62 = vpop.xlane.xlu1 %560 }
 0x121   : > { %v583_v63 = vsub.f32 %v512_v29, %v561_v62  ;;  %v549_v0 = vpop.xlane.xlu0 %548  ;;  %v528_v1 = vpop.xlane.xlu2 %527 }
 0x122   : > { %v579_v2 = vsub.f32 %v461_v28, %v549_v0  ;;  %v572_v4 = vsub.f32 %v361_v31, %v528_v1 }
 0x123   : > { %v611_v3 = vmul.f32 1.442695, %v583_v63 }
 0x124   : > { %v1784_v5 = vpop.eup %1505  ;;  %v603_v6 = vmul.f32 1.442695, %v579_v2  ;;  %v589_v10 = vmul.f32 1.442695, %v572_v4 }
 0x125   : > { %v1786_v7 = vpop.eup %1507  ;;  %1509 = vpow2.f32 %v611_v3  ;;  %v631_v8 = vsel %vm2514_vm1, %v1784_v5, 0.0 }
 0x126   : > { %1511 = vpow2.f32 %v603_v6  ;;  %v619_v9 = vsel %vm2514_vm1, %v1786_v7, 0.0  ;;  %632 = vadd.xlane.f32.xlu1 %v631_v8 }
 0x127   : > { %620 = vadd.xlane.f32.xlu2 %v619_v9  ;;  %1513 = vpow2.f32 %v589_v10  ;;  %v1459_v10 = vld [vmem:[%s1863_s11 + $0x28] sm:$0xff] }
 0x128   : > { %v564_v11 = vpop.xlane.xlu1 %563  ;;  %1067 = vmatpush.bf16.msrb.mxu2 %v1459_v10 }
 0x129   : > { %v584_v12 = vsub.f32 %v1742_v35, %v564_v11  ;;  %v552_v13 = vpop.xlane.xlu0 %551 }
 0x12a   : > { %v580_v14 = vsub.f32 %v1740_v34, %v552_v13 }
 0x12b   : > { %v1794_v15 = vpop.eup %1509  ;;  %v613_v16 = vmul.f32 1.442695, %v584_v12  ;;  %v1461_v12 = vld [vmem:[%s1863_s11 + $0x38] sm:$0xff] }
 0x12c   : > { %v1796_v17 = vpop.eup %1511  ;;  %v605_v18 = vmul.f32 1.442695, %v580_v14  ;;  %v655_v19 = vsel %vm2514_vm1, %v1794_v15, 0.0  ;;  %1114 = vmatpush.bf16.msrb.mxu3 %v1461_v12  ;;  %v1455_v14 = vld [vmem:[%s1863_s11 + $0x8] sm:$0xff] }
 0x12d   : > { %1515 = vpow2.f32 %v613_v16  ;;  %656 = vadd.xlane.f32.xlu0 %v655_v19  ;;  %v643_v20 = vsel %vm2514_vm1, %v1796_v17, 0.0  ;;  %v1802_v23 = vpop.eup %1513  ;;  %v1457_v16 = vld [vmem:[%s1863_s11 + $0x18] sm:$0xff]  ;;  %973 = vmatpush.bf16.msrb.mxu0 %v1455_v14 }
 0x12e   : > { %1517 = vpow2.f32 %v605_v18  ;;  %644 = vadd.xlane.f32.xlu1 %v643_v20  ;;  %v622_v33 = vsel %vm2514_vm1, %v1802_v23, 0.0  ;;  %1020 = vmatpush.bf16.msrb.mxu1 %v1457_v16 }
 0x130   : > { %v540_v21 = vpop.xlane.xlu1 %539  ;;  %v555_v22 = vpop.xlane.xlu2 %554 }
 0x131   : > { %v576_v24 = vsub.f32 %v1748_v38, %v540_v21  ;;  %v581_v25 = vsub.f32 %v1752_v40, %v555_v22  ;;  %v531_v26 = vpop.xlane.xlu0 %530 }
 0x132   : > { %v573_v27 = vsub.f32 %v1750_v39, %v531_v26 }
 0x133   : > { %v1807_v28 = vpop.eup %1515  ;;  %v597_v29 = vmul.f32 1.442695, %v576_v24  ;;  %v607_v30 = vmul.f32 1.442695, %v581_v25 }
 0x134   : > { %v1809_v31 = vpop.eup %1517  ;;  %v591_v32 = vmul.f32 1.442695, %v573_v27  ;;  %v658_v35 = vsel %vm2514_vm1, %v1807_v28, 0.0  ;;  %v1458_v27 = vld [vmem:[%s1863_s11 + $0x20] sm:$0xff] }
 0x135   : > { %1519 = vpow2.f32 %v597_v29  ;;  %623 = vadd.xlane.f32.xlu0 %v622_v33  ;;  %v646_v34 = vsel %vm2514_vm1, %v1809_v31, 0.0  ;;  %v1454_v29 = vld [vmem:[%s1863_s11] sm:$0xff]  ;;  %1068 = vmatpush.bf16.msrb.mxu2 %v1458_v27 }
 0x136   : > { %1521 = vpow2.f32 %v607_v30  ;;  %647 = vadd.xlane.f32.xlu2 %v646_v34  ;;  %659 = vadd.xlane.f32.xlu1 %v658_v35  ;;  %v1460_v35 = vld [vmem:[%s1863_s11 + $0x30] sm:$0xff] }
 0x137   : > { %1523 = vpow2.f32 %v591_v32  ;;  %974 = vmatpush.bf16.msrb.mxu0 %v1454_v29  ;;  %1115 = vmatpush.bf16.msrb.mxu3 %v1460_v35 }
 0x138   : > { %v567_v36 = vpop.xlane.xlu1 %566  ;;  %v570_v37 = vpop.xlane.xlu2 %569 }
 0x139   : > { %v585_v38 = vsub.f32 %v1754_v41, %v567_v36  ;;  %v586_v39 = vsub.f32 %v1766_v47, %v570_v37  ;;  %v558_v40 = vpop.xlane.xlu0 %557 }
 0x13a   : > { %v582_v42 = vsub.f32 %v1764_v46, %v558_v40 }
 0x13b   : > { %v1820_v43 = vpop.eup %1519  ;;  %v615_v44 = vmul.f32 1.442695, %v585_v38  ;;  %v617_v48 = vmul.f32 1.442695, %v586_v39 }
 0x13c   : > { %v1822_v49 = vpop.eup %1521  ;;  %v609_v50 = vmul.f32 1.442695, %v582_v42  ;;  %v634_v41 = vsel %vm2514_vm1, %v1820_v43, 0.0 }
 0x13d   : > { %v1824_v53 = vpop.eup %1523  ;;  %1525 = vpow2.f32 %v615_v44  ;;  %v649_v54 = vsel %vm2514_vm1, %v1822_v49, 0.0 }
 0x13e   : > { %1527 = vpow2.f32 %v617_v48  ;;  %650 = vadd.xlane.f32.xlu0 %v649_v54  ;;  %635 = vadd.xlane.f32.xlu2 %v634_v41  ;;  %v625_v46 = vsel %vm2514_vm1, %v1824_v53, 0.0 }
 0x13f   : > { %1529 = vpow2.f32 %v609_v50  ;;  %626 = vadd.xlane.f32.xlu1 %v625_v46 }
 0x140   : > { %v543_v47 = vpop.xlane.xlu2 %542  ;;  %v534_v55 = vpop.xlane.xlu1 %533 }
 0x141   : > { %v577_v56 = vsub.f32 %v1762_v45, %v543_v47  ;;  %v574_v57 = vsub.f32 %v1774_v51, %v534_v55  ;;  %v546_v58 = vpop.xlane.xlu0 %545 }
 0x142   : > { %v578_v59 = vsub.f32 %v1776_v52, %v546_v58 }
 0x143   : > { %v1835_v60 = vpop.eup %1525  ;;  %v599_v61 = vmul.f32 1.442695, %v577_v56  ;;  %v593_v62 = vmul.f32 1.442695, %v574_v57 }
 0x144   : > { %v1837_v63 = vpop.eup %1527  ;;  %v601_v0 = vmul.f32 1.442695, %v578_v59  ;;  %v661_v45 = vsel %vm2514_vm1, %v1835_v60, 0.0 }
 0x145   : > { %v1839_v1 = vpop.eup %1529  ;;  %1531 = vpow2.f32 %v599_v61  ;;  %v664_v2 = vsel %vm2514_vm1, %v1837_v63, 0.0 }
 0x146   : > { %1533 = vpow2.f32 %v593_v62  ;;  %665 = vadd.xlane.f32.xlu0 %v664_v2  ;;  %662 = vadd.xlane.f32.xlu2 %v661_v45  ;;  %v652_v51 = vsel %vm2514_vm1, %v1839_v1, 0.0  ;;  %v1456_v2 = vld [vmem:[%s1863_s11 + $0x10] sm:$0xff] }
 0x147   : > { %1535 = vpow2.f32 %v601_v0  ;;  %653 = vadd.xlane.f32.xlu1 %v652_v51  ;;  %1021 = vmatpush.bf16.msrb.mxu1 %v1456_v2 }
 0x14b   : > { %v1847_v52 = vpop.eup %1531 }
 0x14c   : > { %v1849_v3 = vpop.eup %1533  ;;  %v637_v4 = vsel %vm2514_vm1, %v1847_v52, 0.0 }
 0x14d   : > { %v1853_v6 = vpop.eup %1535  ;;  %v628_v8 = vsel %vm2514_vm1, %v1849_v3, 0.0 }
 0x14e   : > { %638 = vadd.xlane.f32.xlu0 %v637_v4  ;;  %v640_v9 = vsel %vm2514_vm1, %v1853_v6, 0.0  ;;  %629 = vadd.xlane.f32.xlu2 %v628_v8 }
 0x14f   : > { %641 = vadd.xlane.f32.xlu1 %v640_v9 }
 0x199   : > { %v1866_v11 = vpop.xlane.xlu1 %632 }
 0x19a   : > { %v621_v13 = vpop.xlane.xlu2 %620  ;;  %1537 = vrcp.f32 %v1866_v11  ;;  %v732_v46 = vand.u32 2147483647, %v1866_v11  ;;  %v734_v47 = vand.u32 2147483648, %v1866_v11  ;;  %vm728_vm7 = vweird.f32 %v1866_v11 }
 0x19b   : > { %1539 = vrcp.f32 %v621_v13  ;;  %v678_v32 = vand.u32 2147483648, %v621_v13  ;;  %v676_v34 = vand.u32 2147483647, %v621_v13  ;;  %vm672_vm3 = vweird.f32 %v621_v13 }
 0x19c   : > { %vm1925_vm9 = vcmp.eq.f32.partialorder %v732_v46, 8.507059e+37  ;;  %v735_v8 = vor.u32 1.1754944e-38, %v734_v47 }
 0x19d   : > { %v679_v50 = vor.u32 1.1754944e-38, %v678_v32  ;;  %vm677_vm5 = vcmp.eq.f32.partialorder %v676_v34, 8.507059e+37 }
 0x1a0   : > { %v1872_v18 = vpop.eup %1537  ;;  %v1874_v19 = vpop.xlane.xlu0 %656 }
 0x1a1   : > { %v1540_v20 = vpop.eup %1539  ;;  %v724_v21 = vmul.f32 %v1872_v18, %v1866_v11  ;;  %1541 = vrcp.f32 %v1874_v19  ;;  %v1879_v22 = vpop.xlane.xlu1 %644  ;;  %vm729_vm6 = vweird.f32 %v1872_v18  ;;  %v844_v58 = vand.u32 2147483647, %v1874_v19 }
 0x1a2   : > { %v668_v24 = vmul.f32 %v1540_v20, %v621_v13  ;;  %1543 = vrcp.f32 %v1879_v22  ;;  %vm673_vm2 = vweird.f32 %v1540_v20  ;;  %v846_v59 = vand.u32 2147483648, %v1874_v19  ;;  %vm1921_vm8 = vmor %vm728_vm7, %vm729_vm6 }
 0x1a3   : > { %v725_v26 = vsub.f32 1.0, %v724_v21  ;;  %vm674_vm4 = vmor %vm672_vm3, %vm673_vm2  ;;  %v790_v61 = vand.u32 2147483648, %v1879_v22  ;;  %v788_v0 = vand.u32 2147483647, %v1879_v22  ;;  %vm840_vm10 = vweird.f32 %v1874_v19 }
 0x1a4   : > { %v669_v25 = vsub.f32 1.0, %v668_v24  ;;  %vm1939_vm11 = vcmp.eq.f32.partialorder %v844_v58, 8.507059e+37  ;;  %v847_v14 = vor.u32 1.1754944e-38, %v846_v59  ;;  %vm784_vm12 = vweird.f32 %v1879_v22 }
 0x1a5   : > { %v726_v37 = vmul.f32 %v1872_v18, %v725_v26  ;;  %vm1957_vm14 = vcmp.eq.f32.partialorder %v788_v0, 8.507059e+37 }
 0x1a6   : > { %v670_v30 = vmul.f32 %v1540_v20, %v669_v25 }
 0x1a7   : > { %v1884_v33 = vpop.eup %1541  ;;  %v727_v56 = vadd.f32 %v1872_v18, %v726_v37 }
 0x1a8   : > { %v671_v36 = vadd.f32 %v1540_v20, %v670_v30  ;;  %v836_v38 = vmul.f32 %v1884_v33, %v1874_v19  ;;  %v1890_v39 = vpop.xlane.xlu0 %623  ;;  %v1893_v40 = vpop.eup %1543  ;;  %vm841_vm13 = vweird.f32 %v1884_v33 }
 0x1a9   : > { %1545 = vrcp.f32 %v1890_v39  ;;  %v1896_v42 = vpop.xlane.xlu2 %647  ;;  %v1898_v44 = vpop.xlane.xlu1 %659  ;;  %v780_v41 = vmul.f32 %v1893_v40, %v1879_v22  ;;  %v731_v10 = vsel %vm1921_vm8, %v1872_v18, %v727_v56  ;;  %v690_v29 = vand.u32 2147483647, %v1890_v39  ;;  %vm1984_vm2 = vmor %vm840_vm10, %vm841_vm13 }
 0x1aa   : > { %v675_v48 = vsel %vm674_vm4, %v1540_v20, %v671_v36  ;;  %v837_v54 = vsub.f32 1.0, %v836_v38  ;;  %1547 = vrcp.f32 %v1896_v42  ;;  %v1966_v27 = vsel %vm1925_vm9, %v735_v8, %v731_v10 }
 0x1ab   : > { %v680_v55 = vsel %vm677_vm5, %v679_v50, %v675_v48  ;;  %v781_v57 = vsub.f32 1.0, %v780_v41  ;;  %1549 = vrcp.f32 %v1898_v44  ;;  %v692_v30 = vand.u32 2147483648, %v1890_v39 }
 0x1ac   : > { %v838_v62 = vmul.f32 %v1884_v33, %v837_v54  ;;  %v1930_v9 = vmul.f32 %v1786_v7, %v680_v55  ;;  %v791_v7 = vor.u32 1.1754944e-38, %v790_v61  ;;  %vm785_vm15 = vweird.f32 %v1893_v40 }
 0x1ad   : > { %v782_v11 = vmul.f32 %v1893_v40, %v781_v57  ;;  %vm686_vm0 = vweird.f32 %v1890_v39  ;;  %v804_v36 = vand.u32 2147483648, %v1896_v42  ;;  %v802_v50 = vand.u32 2147483647, %v1896_v42  ;;  %vm1998_vm3 = vmor %vm784_vm12, %vm785_vm15 }
 0x1ae   : > { %907 = vst.msk [vmem:[%s1948_s14] sm:$0xff] %vm2514_vm1, %v1930_v9  ;;  %v839_v21 = vadd.f32 %v1884_v33, %v838_v62  ;;  %v858_v54 = vand.u32 2147483647, %v1898_v44  ;;  %v860_v19 = vand.u32 2147483648, %v1898_v44  ;;  %v693_v56 = vor.u32 1.1754944e-38, %v692_v30 }
 0x1af   : > { %v1917_v45 = vpop.eup %1545  ;;  %v783_v35 = vadd.f32 %v1893_v40, %v782_v11  ;;  %vm798_vm4 = vweird.f32 %v1896_v42  ;;  %vm2010_vm5 = vcmp.eq.f32.partialorder %v690_v29, 8.507059e+37  ;;  %v805_v22 = vor.u32 1.1754944e-38, %v804_v36 }
 0x1b0   : > { %v682_v12 = vmul.f32 %v1917_v45, %v1890_v39  ;;  %v1953_v18 = vpop.eup %1547  ;;  %v843_v41 = vsel %vm1984_vm2, %v1884_v33, %v839_v21  ;;  %vm854_vm6 = vweird.f32 %v1898_v44  ;;  %vm687_vm7 = vweird.f32 %v1917_v45 }
 0x1b1   : > { %v1944_v16 = vpop.xlane.xlu0 %650  ;;  %v1946_v20 = vpop.xlane.xlu2 %635  ;;  %v794_v32 = vmul.f32 %v1953_v18, %v1896_v42  ;;  %v787_v33 = vsel %vm1998_vm3, %v1893_v40, %v783_v35  ;;  %v2018_v62 = vsel %vm1939_vm11, %v847_v14, %v843_v41  ;;  %vm2027_vm8 = vcmp.eq.f32.partialorder %v802_v50, 8.507059e+37  ;;  %vm2060_vm12 = vmor %vm686_vm0, %vm687_vm7 }
 0x1b2   : > { %v683_v25 = vsub.f32 1.0, %v682_v12  ;;  %1551 = vrcp.f32 %v1944_v16  ;;  %v1962_v26 = vpop.eup %1549  ;;  %v1972_v34 = vpop.xlane.xlu1 %626  ;;  %v818_v40 = vand.u32 2147483648, %v1944_v16  ;;  %vm2031_vm9 = vcmp.eq.f32.partialorder %v858_v54, 8.507059e+37 }
 0x1b3   : > { %v850_v37 = vmul.f32 %v1962_v26, %v1898_v44  ;;  %v795_v48 = vsub.f32 1.0, %v794_v32  ;;  %1553 = vrcp.f32 %v1946_v20  ;;  %v861_v10 = vor.u32 1.1754944e-38, %v860_v19 }
 0x1b4   : > { %v684_v46 = vmul.f32 %v1917_v45, %v683_v25  ;;  %1555 = vrcp.f32 %v1972_v34  ;;  %v746_v11 = vand.u32 2147483647, %v1946_v20  ;;  %v923_v13 = vpack.c.bf16 %v1930_v9, %v1930_v9 }
 0x1b5   : > { %v851_v47 = vsub.f32 1.0, %v850_v37  ;;  %v796_v57 = vmul.f32 %v1953_v18, %v795_v48  ;;  %v2044_v21 = vsel %vm1957_vm14, %v791_v7, %v787_v33  ;;  %vm799_vm10 = vweird.f32 %v1953_v18 }
 0x1b6   : > { %v685_v51 = vadd.f32 %v1917_v45, %v684_v46  ;;  %vm855_vm11 = vweird.f32 %v1962_v26  ;;  %v816_v30 = vand.u32 2147483647, %v1944_v16  ;;  %v2064_v36 = vor.u32 1.1754944e-38, %v818_v40  ;;  %vm2075_vm14 = vmor %vm798_vm4, %vm799_vm10 }
 0x1b7   : > { %v852_v61 = vmul.f32 %v1962_v26, %v851_v47  ;;  %v797_v25 = vadd.f32 %v1953_v18, %v796_v57  ;;  %vm742_vm13 = vweird.f32 %v1946_v20  ;;  %v748_v37 = vand.u32 2147483648, %v1946_v20  ;;  %vm2092_vm0 = vmor %vm854_vm6, %vm855_vm11 }
 0x1b8   : > { %v2005_v58 = vpop.eup %1551  ;;  %v689_v48 = vsel %vm2060_vm12, %v1917_v45, %v685_v51  ;;  %vm2079_vm15 = vcmp.eq.f32.partialorder %v746_v11, 8.507059e+37  ;;  %v704_v45 = vand.u32 2147483647, %v1972_v34  ;;  %v706_v47 = vand.u32 2147483648, %v1972_v34 }
 0x1b9   : > { %v808_v0 = vmul.f32 %v2005_v58, %v1944_v16  ;;  %v2024_v2 = vpop.xlane.xlu0 %665  ;;  %v2036_v12 = vpop.xlane.xlu2 %662  ;;  %v853_v29 = vadd.f32 %v1962_v26, %v852_v61  ;;  %v801_v46 = vsel %vm2075_vm14, %v1953_v18, %v797_v25  ;;  %v694_v57 = vsel %vm2010_vm5, %v693_v56, %v689_v48 }
 0x1ba   : > { %v2040_v14 = vpop.eup %1553  ;;  %1557 = vrcp.f32 %v2024_v2  ;;  %v2068_v38 = vpop.xlane.xlu1 %653  ;;  %v888_v61 = vand.u32 2147483648, %v2024_v2  ;;  %v874_v11 = vand.u32 2147483648, %v2036_v12  ;;  %v2120_v56 = vsel %vm2027_vm8, %v805_v22, %v801_v46 }
 0x1bb   : > { %v738_v32 = vmul.f32 %v2040_v14, %v1946_v20  ;;  %v2054_v35 = vpop.eup %1555  ;;  %v809_v24 = vsub.f32 1.0, %v808_v0  ;;  %1559 = vrcp.f32 %v2036_v12  ;;  %v857_v19 = vsel %vm2092_vm0, %v1962_v26, %v853_v29 }
 0x1bc   : > { %v696_v41 = vmul.f32 %v2054_v35, %v1972_v34  ;;  %vm743_vm2 = vweird.f32 %v2040_v14  ;;  %1561 = vrcp.f32 %v2068_v38  ;;  %v2124_v59 = vsel %vm2031_vm9, %v861_v10, %v857_v19 }
 0x1bd   : > { %v739_v50 = vsub.f32 1.0, %v738_v32  ;;  %v810_v33 = vmul.f32 %v2005_v58, %v809_v24  ;;  %vm2128_vm3 = vmor %vm742_vm13, %vm743_vm2  ;;  %v749_v29 = vor.u32 1.1754944e-38, %v748_v37  ;;  %v2132_v32 = vor.u32 1.1754944e-38, %v706_v47 }
 0x1be   : > { %v697_v55 = vsub.f32 1.0, %v696_v41  ;;  %v832_v22 = vand.u32 2147483648, %v2068_v38  ;;  %v886_v24 = vand.u32 2147483647, %v2024_v2  ;;  %v2147_v37 = vor.u32 1.1754944e-38, %v888_v61 }
 0x1bf   : > { %v740_v18 = vmul.f32 %v2040_v14, %v739_v50  ;;  %v2144_v20 = vadd.f32 %v2005_v58, %v810_v33  ;;  %v872_v48 = vand.u32 2147483647, %v2036_v12  ;;  %v2155_v50 = vor.u32 1.1754944e-38, %v874_v11 }
 0x1c0   : > { %v2104_v44 = vpop.eup %1557  ;;  %v698_v40 = vmul.f32 %v2054_v35, %v697_v55  ;;  %v830_v41 = vand.u32 2147483647, %v2068_v38  ;;  %vm813_vm4 = vweird.f32 %v2005_v58  ;;  %v892_v19 = vmul.f32 %v1802_v23, %v694_v57 }
 0x1c1   : > { %v2111_v0 = vpop.xlane.xlu0 %638  ;;  %v741_v26 = vadd.f32 %v2040_v14, %v740_v18  ;;  %v878_v51 = vmul.f32 %v2104_v44, %v2024_v2  ;;  %v2139_v8 = vpop.xlane.xlu2 %629  ;;  %v2172_v61 = vor.u32 1.1754944e-38, %v832_v22  ;;  %vm812_vm5 = vweird.f32 %v1944_v16 }
 0x1c2   : > { %1563 = vrcp.f32 %v2111_v0  ;;  %v2141_v10 = vpop.eup %1559  ;;  %v2168_v18 = vpop.xlane.xlu1 %641  ;;  %v760_v54 = vand.u32 2147483647, %v2111_v0  ;;  %908 = vst.msk [vmem:[%s1948_s14 + $0x8] sm:$0xff] %vm2514_vm1, %v892_v19  ;;  %v943_v23 = vunpack.c.l.b16 %v923_v13  ;;  %v718_v57 = vand.u32 2147483647, %v2139_v8  ;;  %vm2274_vm7 = vmor %vm812_vm5, %vm813_vm4 }
 0x1c3   : > { %v745_v7 = vsel %vm2128_vm3, %v2040_v14, %v741_v26  ;;  %v879_v4 = vsub.f32 1.0, %v878_v51  ;;  %v2151_v14 = vadd.f32 %v2054_v35, %v698_v40  ;;  %v864_v39 = vmul.f32 %v2141_v10, %v2036_v12  ;;  %v2158_v46 = vpop.eup %1561 }
 0x1c4   : > { %v2163_v42 = vsel %vm2079_vm15, %v749_v29, %v745_v7  ;;  %1565 = vrcp.f32 %v2139_v8  ;;  %v822_v33 = vmul.f32 %v2158_v46, %v2068_v38  ;;  %v762_v26 = vand.u32 2147483648, %v2111_v0 }
 0x1c5   : > { %v880_v47 = vmul.f32 %v2104_v44, %v879_v4  ;;  %v865_v55 = vsub.f32 1.0, %v864_v39  ;;  %v924_v40 = vpack.c.bf16 %v892_v19, %v892_v19  ;;  %vm756_vm6 = vweird.f32 %v2111_v0 }
 0x1c6   : > { %v823_v25 = vsub.f32 1.0, %v822_v33  ;;  %v720_v29 = vand.u32 2147483648, %v2139_v8  ;;  %1567 = vrcp.f32 %v2168_v18  ;;  %vm827_vm9 = vweird.f32 %v2158_v46 }
 0x1c7   : > { %v866_v11 = vmul.f32 %v2141_v10, %v865_v55  ;;  %v2190_v7 = vadd.f32 %v2104_v44, %v880_v47  ;;  %v944_v13 = vunpack.c.l.b16 %v924_v40  ;;  %v2200_v22 = vor.u32 1.1754944e-38, %v762_v26 }
 0x1c8   : > { %v2183_v51 = vpop.eup %1563  ;;  %v824_v4 = vmul.f32 %v2158_v46, %v823_v25  ;;  %v776_v33 = vand.u32 2147483648, %v2168_v18  ;;  %vm2214_vm0 = vcmp.eq.f32.partialorder %v718_v57, 8.507059e+37  ;;  %v721_v25 = vor.u32 1.1754944e-38, %v720_v29 }
 0x1c9   : > { %v752_v9 = vmul.f32 %v2183_v51, %v2111_v0  ;;  %vm757_vm11 = vweird.f32 %v2183_v51  ;;  %v2207_v47 = vadd.f32 %v2141_v10, %v866_v11  ;;  %v947_v55 = vpack.c.b16 %v944_v13, %v943_v23 }
 0x1ca   : > { %v2203_v39 = vpop.eup %1565  ;;  %v774_v11 = vand.u32 2147483647, %v2168_v18  ;;  %v899_v23 = vmul.f32 %v1796_v17, %v2044_v21  ;;  %vm2223_vm2 = vcmp.eq.f32.partialorder %v816_v30, 8.507059e+37  ;;  %v2228_v13 = vadd.f32 %v2158_v46, %v824_v4  ;;  %vm2296_vm4 = vmor %vm756_vm6, %vm757_vm11 }
 0x1cb   : > { %v753_v19 = vsub.f32 1.0, %v752_v9  ;;  %v710_v26 = vmul.f32 %v2203_v39, %v2139_v8  ;;  %vm2230_vm3 = vcmp.eq.f32.partialorder %v830_v41, 8.507059e+37  ;;  %1396 = vmatmul.msk.bf16.vlgmr.msrb.gmra.mxu0 %vm2514_vm1, %v947_v55  ;;  %v900_v17 = vmul.f32 %v1809_v31, %v2120_v56 }
 0x1cc   : > { %v2240_v21 = vpop.eup %1567  ;;  %915 = vst.msk [vmem:[%s1948_s14 + $0x40] sm:$0xff] %vm2514_vm1, %v899_v23  ;;  %v931_v41 = vpack.c.bf16 %v899_v23, %v899_v23  ;;  %v903_v4 = vmul.f32 %v1794_v15, %v2018_v62  ;;  %vm2251_vm15 = vcmp.eq.f32.partialorder %v886_v24, 8.507059e+37  ;;  %vm2257_vm10 = vcmp.eq.f32.partialorder %v872_v48, 8.507059e+37 }
 0x1cd   : > { %v754_v29 = vmul.f32 %v2183_v51, %v753_v19  ;;  %v711_v30 = vsub.f32 1.0, %v710_v26  ;;  %v904_v19 = vmul.f32 %v1807_v28, %v2124_v59  ;;  %vm2262_vm13 = vcmp.eq.f32.partialorder %v760_v54, 8.507059e+37  ;;  %916 = vst.msk [vmem:[%s1948_s14 + $0x48] sm:$0xff] %vm2514_vm1, %v900_v17 }
 0x1ce   : > { %v766_v15 = vmul.f32 %v2240_v21, %v2168_v18  ;;  %v777_v28 = vor.u32 1.1754944e-38, %v776_v33  ;;  %v932_v62 = vpack.c.bf16 %v900_v17, %v900_v17  ;;  %vm2280_vm14 = vcmp.eq.f32.partialorder %v774_v11, 8.507059e+37  ;;  %919 = vst.msk [vmem:[%s1948_s14 + $0x60] sm:$0xff] %vm2514_vm1, %v903_v4 }
 0x1cf   : > { %v755_v56 = vadd.f32 %v2183_v51, %v754_v29  ;;  %v712_v24 = vmul.f32 %v2203_v39, %v711_v30  ;;  %v935_v54 = vpack.c.bf16 %v903_v4, %v903_v4  ;;  %v936_v33 = vpack.c.bf16 %v904_v19, %v904_v19  ;;  %920 = vst.msk [vmem:[%s1948_s14 + $0x68] sm:$0xff] %vm2514_vm1, %v904_v19 }
 0x1d0   : > { %vm2288_vm8 = vcmp.eq.f32.partialorder %v704_v45, 8.507059e+37  ;;  %v2561_v16 = vmov 0  ;;  %v767_v23 = vsub.f32 1.0, %v766_v15  ;;  %v1037_v29 = vunpack.c.l.b16 %v931_v41 }
 0x1d1   : > { %v2562_v16 = vsel %vm2288_vm8, 4294967295, %v2561_v16  ;;  %v1038_v17 = vunpack.c.l.b16 %v932_v62  ;;  %v895_v45 = vmul.f32 %v1784_v5, %v1966_v27  ;;  %vm2565_vm5 = vweird.f32 %v2068_v38 }
 0x1d2   : > { %vm2308_vm12 = vmor %vm2565_vm5, %vm827_vm9  ;;  %v759_v0 = vsel %vm2296_vm4, %v2183_v51, %v755_v56  ;;  %v713_v41 = vadd.f32 %v2203_v39, %v712_v24  ;;  %v1084_v4 = vunpack.c.l.b16 %v935_v54  ;;  %v1085_v15 = vunpack.c.l.b16 %v936_v33 }
 0x1d3   : > { %vm2568_vm6 = vweird.f32 %v2203_v39  ;;  %vm2569_vm11 = vweird.f32 %v2139_v8  ;;  %v768_v5 = vmul.f32 %v2240_v21, %v767_v23  ;;  %v1041_v27 = vpack.c.b16 %v1038_v17, %v1037_v29 }
 0x1d4   : > { %vm716_vm1 = vmor %vm2569_vm11, %vm2568_vm6  ;;  %v896_v38 = vmul.f32 %v1820_v43, %v2163_v42  ;;  %vm2570_vm9 = vcmask 261120   ;;  %v927_v19 = vpack.c.bf16 %v895_v45, %v895_v45  ;;  %vm2571_vm4 = vweird.f32 %v2104_v44 }
 0x1d5   : > { %911 = vst.msk [vmem:[%s1948_s14 + $0x20] sm:$0xff] %vm2570_vm9, %v895_v45  ;;  %vm2572_vm5 = vweird.f32 %v2024_v2  ;;  %v717_v8 = vsel %vm716_vm1, %v2203_v39, %v713_v41  ;;  %v1088_v56 = vpack.c.b16 %v1085_v15, %v1084_v4  ;;  %v815_v62 = vsel %vm2274_vm7, %v2005_v58, %v2144_v20 }
 0x1d6   : > { %vm2329_vm8 = vmor %vm2572_vm5, %vm2571_vm4  ;;  %v829_v43 = vsel %vm2308_vm12, %v2158_v46, %v2228_v13  ;;  %vm2575_vm6 = vweird.f32 %v2141_v10  ;;  %vm2576_vm11 = vweird.f32 %v2036_v12  ;;  %v722_v42 = vsel %vm2214_vm0, %v721_v25, %v717_v8 }
 0x1d7   : > { %vm2346_vm9 = vmor %vm2576_vm11, %vm2575_vm6  ;;  %v769_v39 = vadd.f32 %v2240_v21, %v768_v5  ;;  %vm2579_vm1 = vcmask 261120   ;;  %v928_v58 = vpack.c.bf16 %v896_v38, %v896_v38  ;;  %v990_v20 = vunpack.c.l.b16 %v927_v19 }
 0x1d8   : > { %1416 = vmatmul.msk.bf16.vlgmr.msrb.gmra.mxu2 %vm2579_vm1, %v1041_v27  ;;  %vm2580_vm7 = vmmov %vm2579_vm1  ;;  %vm2581_vm12 = vweird.f32 %v2240_v21  ;;  %vm2582_vm4 = vweird.f32 %v2168_v18  ;;  %v820_v46 = vsel %vm2223_vm2, %v2064_v36, %v815_v62  ;;  %v834_v40 = vsel %vm2230_vm3, %v2172_v61, %v829_v43 }
 0x1d9   : > { %912 = vst.msk [vmem:[%s1948_s14 + $0x28] sm:$0xff] %vm2580_vm7, %v896_v38  ;;  %vm2360_vm5 = vmor %vm2582_vm4, %vm2581_vm12  ;;  %v871_v18 = vsel %vm2346_vm9, %v2141_v10, %v2207_v47  ;;  %v885_v25 = vsel %vm2329_vm8, %v2104_v44, %v2190_v7  ;;  %vm2586_vm0 = vweird.f32 %v2054_v35  ;;  %vm2587_vm11 = vweird.f32 %v1972_v34 }
 0x1da   : > { %vm2585_vm6 = vmmov %vm2579_vm1  ;;  %v773_v61 = vsel %vm2360_vm5, %v2240_v21, %v769_v39  ;;  %v991_v9 = vunpack.c.l.b16 %v928_v58  ;;  %v901_v10 = vmul.f32 %v1822_v49, %v820_v46  ;;  %v902_v47 = vmul.f32 %v1839_v1, %v834_v40 }
 0x1db   : > { %1426 = vmatmul.msk.bf16.vlgmr.msrb.gmra.mxu3 %vm2585_vm6, %v1088_v56  ;;  %vm2383_vm2 = vmor %vm2587_vm11, %vm2586_vm0  ;;  %v764_v44 = vsel %vm2262_vm13, %v2200_v22, %v759_v0  ;;  %v876_v34 = vsel %vm2257_vm10, %v2155_v50, %v871_v18  ;;  %v890_v7 = vsel %vm2251_vm15, %v2147_v37, %v885_v25  ;;  %v778_v1 = vsel %vm2280_vm14, %v777_v28, %v773_v61 }
 0x1dc   : > { %v703_v49 = vsel %vm2383_vm2, %v2054_v35, %v2151_v14  ;;  %v994_v13 = vpack.c.b16 %v991_v9, %v990_v20  ;;  %vm2590_vm8 = vmmov %vm2579_vm1  ;;  %v934_v22 = vpack.c.bf16 %v902_v47, %v902_v47  ;;  %v905_v57 = vmul.f32 %v1835_v60, %v876_v34 }
 0x1dd   : > { %917 = vst.msk [vmem:[%s1948_s14 + $0x50] sm:$0xff] %vm2590_vm8, %v901_v10  ;;  %vm2591_vm10 = vmmov %vm2579_vm1  ;;  %v933_v50 = vpack.c.bf16 %v901_v10, %v901_v10  ;;  %v906_v37 = vmul.f32 %v1837_v63, %v890_v7  ;;  %vm2592_vm13 = vnez %v2562_v16  ;;  %v894_v14 = vmul.f32 %v1849_v3, %v722_v42 }
 0x1de   : > { %918 = vst.msk [vmem:[%s1948_s14 + $0x58] sm:$0xff] %vm2591_vm10, %v902_v47  ;;  %v708_v35 = vsel %vm2592_vm13, %v2132_v32, %v703_v49  ;;  %vm2593_vm14 = vmmov %vm2579_vm1  ;;  %v937_v21 = vpack.c.bf16 %v905_v57, %v905_v57  ;;  %v897_v55 = vmul.f32 %v1847_v52, %v764_v44  ;;  %v898_v26 = vmul.f32 %v1853_v6, %v778_v1 }
 0x1df   : > { %1406 = vmatmul.msk.bf16.vlgmr.msrb.gmra.mxu1 %vm2593_vm14, %v994_v13  ;;  %vm2594_vm15 = vmmov %vm2579_vm1  ;;  %v893_v60 = vmul.f32 %v1824_v53, %v708_v35  ;;  %v938_v63 = vpack.c.bf16 %v906_v37, %v906_v37  ;;  %v926_v31 = vpack.c.bf16 %v894_v14, %v894_v14  ;;  %v1040_v32 = vunpack.c.l.b16 %v934_v22  ;;  %910 = vst.msk [vmem:[%s1948_s14 + $0x18] sm:$0xff] %vm2579_vm1, %v894_v14 }
 0x1e0   : > { %921 = vst.msk [vmem:[%s1948_s14 + $0x70] sm:$0xff] %vm2594_vm15, %v905_v57  ;;  %vm2595_vm3 = vmmov %vm2579_vm1  ;;  %v1086_v28 = vunpack.c.l.b16 %v937_v21  ;;  %v1039_v24 = vunpack.c.l.b16 %v933_v50  ;;  %v930_v53 = vpack.c.bf16 %v898_v26, %v898_v26  ;;  %v929_v33 = vpack.c.bf16 %v897_v55, %v897_v55 }
 0x1e1   : > { %922 = vst.msk [vmem:[%s1948_s14 + $0x78] sm:$0xff] %vm2595_vm3, %v906_v37  ;;  %vm2596_vm9 = vmmov %vm2579_vm1  ;;  %v925_v3 = vpack.c.bf16 %v893_v60, %v893_v60  ;;  %v946_v59 = vunpack.c.l.b16 %v926_v31  ;;  %v1087_v52 = vunpack.c.l.b16 %v938_v63 }
 0x1e2   : > { %909 = vst.msk [vmem:[%s1948_s14 + $0x10] sm:$0xff] %vm2596_vm9, %v893_v60  ;;  %vm2597_vm7 = vmmov %vm2579_vm1  ;;  %v1042_v54 = vpack.c.b16 %v1040_v32, %v1039_v24  ;;  %v993_v11 = vunpack.c.l.b16 %v930_v53  ;;  %v992_v23 = vunpack.c.l.b16 %v929_v33 }
 0x1e3   : > { %v945_v48 = vunpack.c.l.b16 %v925_v3  ;;  %913 = vst.msk [vmem:[%s1948_s14 + $0x30] sm:$0xff] %vm2597_vm7, %v897_v55  ;;  %vm2598_vm12 = vmmov %vm2579_vm1  ;;  %v1089_v16 = vpack.c.b16 %v1087_v52, %v1086_v28 }
 0x1e4   : > { %914 = vst.msk [vmem:[%s1948_s14 + $0x38] sm:$0xff] %vm2598_vm12, %v898_v26  ;;  %vm2599_vm4 = vmmov %vm2579_vm1  ;;  %v995_v29 = vpack.c.b16 %v993_v11, %v992_v23 }
 0x1e5   : > { %v948_v6 = vpack.c.b16 %v946_v59, %v945_v48  ;;  %vm2600_vm5 = vmmov %vm2579_vm1 }
 0x1e6   : > { %vm2601_vm6 = vmmov %vm2579_vm1 }
 0x1e7   : > { %1397 = vmatmul.msk.bf16.gmra.mxu0 %vm2599_vm4, %v948_v6  ;;  %vm2602_vm0 = vmmov %vm2579_vm1 }
 0x1e8   : > { %1417 = vmatmul.msk.bf16.gmra.mxu2 %vm2600_vm5, %v1042_v54 }
 0x1eb   : > { %1427 = vmatmul.msk.bf16.gmra.mxu3 %vm2601_vm6, %v1089_v16 }
 0x1ef   : > { %1407 = vmatmul.msk.bf16.gmra.mxu1 %vm2602_vm0, %v995_v29 }
 0x1f0   : > { %1596 = shalt.err (!%p1593_p3)
}
 0x1f1   : > { %s1633_s12 = smov 128   ;;  %s1634_s13 = smov 8   ;;  %vm1143_vm11 = vcmask 125952  }
 0x1f2   : > { %1464 = dma.vmem_to_hbm [thread:$0]  (%p1698_p5), %s1185_s22, 2048, %s1187_s30, %s1167_s5, %s1633_s12, %s1633_s12, %s1634_s13  }
 0x1f3   : > { %s2458_s23 = scalar_lea.vmem %s2512_s3, %s1709_s28 }
 0x248   : > { %v976_v17 = vpop.f32.mrf.mxu0 }
 0x249   : > { %v1127_v45 = vpack.c.bf16 %v976_v17, %v976_v17 }
 0x24b   : > { %1144 = vst.msk [vmem:[%s2458_s23] sm:$0xf] %vm1143_vm11, %v1127_v45 }
 0x250   : > { %v978_v30 = vpop.f32.mrf.mxu0 }
 0x251   : > { %v1128_v0 = vpack.c.bf16 %v978_v30, %v978_v30 }
 0x253   : > { %1145 = vst.msk [vmem:[%s2458_s23 + $0x4] sm:$0xf] %vm1143_vm11, %v1128_v0 }
 0x25b   : > { %v1070_v41 = vpop.f32.mrf.mxu2 }
 0x25c   : > { %v1023_v4 = vpop.f32.mrf.mxu1  ;;  %v1135_v27 = vpack.c.bf16 %v1070_v41, %v1070_v41 }
 0x25d   : > { %v1131_v5 = vpack.c.bf16 %v1023_v4, %v1023_v4 }
 0x25e   : > { %v1117_v15 = vpop.f32.mrf.mxu3  ;;  %1152 = vst.msk [vmem:[%s2458_s23 + $0x20] sm:$0xf] %vm1143_vm11, %v1135_v27 }
 0x25f   : > { %v1139_v38 = vpack.c.bf16 %v1117_v15, %v1117_v15  ;;  %1148 = vst.msk [vmem:[%s2458_s23 + $0x10] sm:$0xf] %vm1143_vm11, %v1131_v5 }
 0x261   : > { %1156 = vst.msk [vmem:[%s2458_s23 + $0x30] sm:$0xf] %vm1143_vm11, %v1139_v38 }
 0x263   : > { %v1072_v19 = vpop.f32.mrf.mxu2 }
 0x264   : > { %v1025_v51 = vpop.f32.mrf.mxu1  ;;  %v981_v62 = vpop.f32.mrf.mxu0  ;;  %v1136_v43 = vpack.c.bf16 %v1072_v19, %v1072_v19 }
 0x265   : > { %v1132_v56 = vpack.c.bf16 %v1025_v51, %v1025_v51  ;;  %v1129_v2 = vpack.c.bf16 %v981_v62, %v981_v62 }
 0x266   : > { %v1119_v8 = vpop.f32.mrf.mxu3  ;;  %1153 = vst.msk [vmem:[%s2458_s23 + $0x24] sm:$0xf] %vm1143_vm11, %v1136_v43 }
 0x267   : > { %v1140_v42 = vpack.c.bf16 %v1119_v8, %v1119_v8  ;;  %1149 = vst.msk [vmem:[%s2458_s23 + $0x14] sm:$0xf] %vm1143_vm11, %v1132_v56 }
 0x268   : > { %1146 = vst.msk [vmem:[%s2458_s23 + $0x8] sm:$0xf] %vm1143_vm11, %v1129_v2 }
 0x269   : > { %1157 = vst.msk [vmem:[%s2458_s23 + $0x34] sm:$0xf] %vm1143_vm11, %v1140_v42 }
 0x26b   : > { %v1075_v39 = vpop.f32.mrf.mxu2 }
 0x26c   : > { %v1028_v58 = vpop.f32.mrf.mxu1  ;;  %v983_v46 = vpop.f32.mrf.mxu0  ;;  %v1137_v40 = vpack.c.bf16 %v1075_v39, %v1075_v39 }
 0x26d   : > { %v1133_v12 = vpack.c.bf16 %v1028_v58, %v1028_v58  ;;  %v1130_v18 = vpack.c.bf16 %v983_v46, %v983_v46 }
 0x26e   : > { %v1122_v20 = vpop.f32.mrf.mxu3  ;;  %1154 = vst.msk [vmem:[%s2458_s23 + $0x28] sm:$0xf] %vm1143_vm11, %v1137_v40 }
 0x26f   : > { %v1141_v25 = vpack.c.bf16 %v1122_v20, %v1122_v20  ;;  %1150 = vst.msk [vmem:[%s2458_s23 + $0x18] sm:$0xf] %vm1143_vm11, %v1133_v12 }
 0x270   : > { %1147 = vst.msk [vmem:[%s2458_s23 + $0xc] sm:$0xf] %vm1143_vm11, %v1130_v18 }
 0x271   : > { %1158 = vst.msk [vmem:[%s2458_s23 + $0x38] sm:$0xf] %vm1143_vm11, %v1141_v25 }
 0x273   : > { %v1077_v36 = vpop.f32.mrf.mxu2 }
 0x274   : > { %v1030_v61 = vpop.f32.mrf.mxu1  ;;  %v1138_v47 = vpack.c.bf16 %v1077_v36, %v1077_v36 }
 0x275   : > { %v1134_v10 = vpack.c.bf16 %v1030_v61, %v1030_v61 }
 0x276   : > { %v1124_v9 = vpop.f32.mrf.mxu3  ;;  %1155 = vst.msk [vmem:[%s2458_s23 + $0x2c] sm:$0xf] %vm1143_vm11, %v1138_v47 }
 0x277   : > { %v1142_v44 = vpack.c.bf16 %v1124_v9, %v1124_v9  ;;  %1151 = vst.msk [vmem:[%s2458_s23 + $0x1c] sm:$0xf] %vm1143_vm11, %v1134_v10 }
 0x279   : > { %1159 = vst.msk [vmem:[%s2458_s23 + $0x3c] sm:$0xf] %vm1143_vm11, %v1142_v44 }
 0x27a PF: > { %p1470_p4 = scmp.ge.s32.totalorder %s1631_s18, 2  ;;  %s1210_s25 = sand.u32 1, %s1619_s15  }
 0x27b   : > { %s1211_s28 = scalar_lea.sflag [#allocation3], %s1210_s25 }
 0x27c   : > { %p1467_p5 = pnand %p1470_p4, %p1702_p6 }
 0x27e   : > { %p1468_p7 = pneg %p1467_p5 }
 0x280   : > { %1614 = dma.done.wait (%p1468_p7), %s1211_s28, 2048  }
 0x281   : > { %1616 = vsyncadd (%p1468_p7), %s1211_s28, 4294965248  ;;  %p15_p8 = scmp.ge.s32.totalorder %s1685_s21, 4   ;;  %s2603_s15 = smov %s1623_s16 }
 0x282   : > { %s2604_s16 = smov %s1627_s17  ;;  %s2605_s17 = smov %s1696_s24 }
 0x283   : > { %s2606_s18 = smov %s1685_s21  ;;  %17 = sbr.rel (!%p15_p8) target bundleno = 3 (0x3), region = 85 }
 0x288   :  { %1217 = vsyncpa [#allocation3], 1 }
 0x289   :  { %1219 = vsyncpa [#allocation3 + $0x1], 1 }

</bundles_post_ra>
